<compile_context>
chip_gen: v5e
topology: v5e:2x2
jax: 0.10.0
libtpu: 0.0.40
codegen_flags: <defaults>
</compile_context>

<pallas_src>
import math
import numpy as np

import jax
import jax.numpy as jnp
from jax.experimental import pallas as pl
from jax.experimental.pallas import tpu as pltpu

HIDDEN = 64
N_HEAD = 4
D_HEAD = HIDDEN // N_HEAD
N_NORMAL = 6                     # output_normal_actions
SCALE = 1.0 / math.sqrt(D_HEAD)
OUT_W = 2 * HIDDEN               # single 128-lane output slab: [Q(64) | h_new(64)]


def _dual_tensorcore():
    """True only for dual-TensorCore chips (v7x) where a >=2-step grid pays off."""
    try:
        kind = jax.devices()[0].device_kind.lower().replace(" ", "")
        return ("v7" in kind) or ("tpu7" in kind)
    except Exception:
        return False


def _make_kernel(n_allies, n_enemies, tile_b):
    E = 1 + n_allies + n_enemies
    H = HIDDEN
    TB = tile_b
    f32 = jnp.float32
    bf16 = jnp.bfloat16

    def kernel(own_ref, ally_ref, enemy_ref, h_ref,
               w_own_ref, b_own_ref, w_ally_ref, b_ally_ref,
               w_enemy_ref, b_enemy_ref,
               head_sel_ref, w_gru_ref, b_gru_ref,
               w_head_ref, b_head_ref, int_sel_ref,
               out_ref):

        def mm(x, w):
            # bf16 MXU operands, f32 accumulation
            return jnp.dot(x.astype(bf16), w, preferred_element_type=f32)

        # ---- fused entity embeddings (downstream projections folded into weights) ----
        # own:   (TB, own_dim)            -> (TB, 3H)            [K|V | q]
        # ally:  (n_allies*TB, ally_dim)  -> (n_allies*TB, 2H)   [K|V]
        # enemy: (n_enemies*TB, enemy_dim)-> (n_enemies*TB, 3H)  [K|V | k2]
        own_o = mm(own_ref[...], w_own_ref[...]) + b_own_ref[...]
        ally_o = mm(ally_ref[...].reshape(n_allies * TB, -1),
                    w_ally_ref[...]) + b_ally_ref[...]
        enemy_o = mm(enemy_ref[...].reshape(n_enemies * TB, -1),
                     w_enemy_ref[...]) + b_enemy_ref[...]

        q = own_o[:, 2 * H:3 * H]                                   # (TB, H)

        def kv_of(e):
            if e == 0:
                return own_o[:, :2 * H]
            if e <= n_allies:
                j = e - 1
                return ally_o[j * TB:(j + 1) * TB, :]
            j = e - 1 - n_allies
            return enemy_o[j * TB:(j + 1) * TB, :2 * H]

        def score(kv_e):
            # per-head reduce + broadcast via block-diagonal selector (SCALE baked in);
            # result is duplicated over both 64-lane halves so it can scale [K|V] directly
            return mm(q * kv_e[:, :H], head_sel_ref[...])           # (TB, 2H)

        # ---- CrossAttentionBlock softmax over entities (fused exp/den/acc pass) ----
        kvs = [kv_of(e) for e in range(E)]
        scores = [score(kv) for kv in kvs]
        m = scores[0]
        for s in scores[1:]:
            m = jnp.maximum(m, s)
        ex = jnp.exp(scores[0] - m)
        den = ex
        acc = ex * kvs[0]
        for e in range(1, E):
            ex = jnp.exp(scores[e] - m)
            den = den + ex
            acc = acc + ex * kvs[e]
        attn_v = (acc * pl.reciprocal(den, approx=True))[:, H:]     # (TB, H)

        # ---- fused GRUCell: one (TB,2H)x(2H,4H) matmul ----
        h_prev = h_ref[...]
        g = mm(jnp.concatenate([attn_v, h_prev], axis=-1), w_gru_ref[...]) + b_gru_ref[...]
        r = jax.nn.sigmoid(g[:, 0:H])
        z = jax.nn.sigmoid(g[:, H:2 * H])
        n = jnp.tanh(g[:, 2 * H:3 * H] + r * g[:, 3 * H:4 * H])
        h_new = (1.0 - z) * n + z * h_prev                          # (TB, H)

        # ---- fused output head: [q_normal slab (64) | qa (64)] in one matmul ----
        head = mm(h_new, w_head_ref[...]) + b_head_ref[...]         # (TB, 2H)
        q64 = head[:, :H]
        qa = head[:, H:]
        # per-enemy reduce + (SCALE/N_HEAD) scale + column placement selector matmuls
        for j in range(n_enemies):
            k2_j = enemy_o[j * TB:(j + 1) * TB, 2 * H:3 * H]
            q64 = q64 + mm(qa * k2_j, int_sel_ref[j * H:(j + 1) * H, :])

        # single lane-dense 128-wide output: Q values in lanes [0, 64), h_new in [64, 128)
        out_ref[...] = jnp.concatenate([q64, h_new], axis=-1)

    return kernel


def init_params(key, own_dim, ally_dim, enemy_dim):
    keys = jax.random.split(key, 11)

    def linear(k, din, dout, bias=True):
        kw, kb = jax.random.split(k)
        lim = 1.0 / math.sqrt(din)
        w = jax.random.uniform(kw, (din, dout), jnp.float32, -lim, lim)
        if not bias:
            return w
        b = jax.random.uniform(kb, (1, dout), jnp.float32, -lim, lim)
        return w, b

    w_own, b_own = linear(keys[0], own_dim, HIDDEN)
    w_ally, b_ally = linear(keys[1], ally_dim, HIDDEN)
    w_enemy, b_enemy = linear(keys[2], enemy_dim, HIDDEN)
    wq = linear(keys[3], HIDDEN, HIDDEN, bias=False)
    wk = linear(keys[4], HIDDEN, HIDDEN, bias=False)
    wv = linear(keys[5], HIDDEN, HIDDEN, bias=False)
    wih, bih = linear(keys[6], HIDDEN, 3 * HIDDEN)    # GRU W_ih (stored transposed: H x 3H, gates r|z|n)
    whh, bhh = linear(keys[7], HIDDEN, 3 * HIDDEN)    # GRU W_hh (stored transposed)
    wn, bn = linear(keys[8], HIDDEN, N_NORMAL)
    wq2 = linear(keys[9], HIDDEN, HIDDEN, bias=False)
    wk2 = linear(keys[10], HIDDEN, HIDDEN, bias=False)
    return dict(w_own=w_own, b_own=b_own, w_ally=w_ally, b_ally=b_ally,
                w_enemy=w_enemy, b_enemy=b_enemy, wq=wq, wk=wk, wv=wv,
                wih=wih, whh=whh, bih=bih, bhh=bhh, wn=wn, bn=bn,
                wq2=wq2, wk2=wk2)


def _fuse_params(params, n_enemies):
    """Fold projections into embedding weights, build selectors, cast MXU weights to bf16."""
    p = params
    H = HIDDEN
    bf16 = jnp.bfloat16

    w_kv = jnp.concatenate([p['wk'], p['wv']], axis=1)                           # (H, 2H)

    # own:   feats -> [K|V | q]      (K|V kept in the first 128 lanes for v5e's 128-wide MXU)
    w_own_f = jnp.concatenate([p['w_own'] @ w_kv, p['w_own'] @ p['wq']], axis=1)
    b_own_f = jnp.concatenate([p['b_own'] @ w_kv, p['b_own'] @ p['wq']], axis=1)
    # ally:  feats -> [K|V]
    w_ally_f = p['w_ally'] @ w_kv
    b_ally_f = p['b_ally'] @ w_kv
    # enemy: feats -> [K|V | k2]
    w_enemy_f = jnp.concatenate([p['w_enemy'] @ w_kv, p['w_enemy'] @ p['wk2']], axis=1)
    b_enemy_f = jnp.concatenate([p['b_enemy'] @ w_kv, p['b_enemy'] @ p['wk2']], axis=1)

    # block-diagonal per-head selector (SCALE baked in), duplicated over both 64-lane halves
    ii = np.arange(H)[:, None] // D_HEAD
    jj = (np.arange(2 * H)[None, :] % H) // D_HEAD
    head_sel = jnp.asarray((ii == jj).astype(np.float32) * SCALE)                # (H, 2H)

    # fused GRU weight: [x | h] @ w_gru -> [rz_sum(2H) | gi_n(H) | gh_n(H)]
    w_gru = jnp.zeros((2 * H, 4 * H), jnp.float32)
    w_gru = w_gru.at[:H, :2 * H].set(p['wih'][:, :2 * H])
    w_gru = w_gru.at[H:, :2 * H].set(p['whh'][:, :2 * H])
    w_gru = w_gru.at[:H, 2 * H:3 * H].set(p['wih'][:, 2 * H:])
    w_gru = w_gru.at[H:, 3 * H:].set(p['whh'][:, 2 * H:])
    b_gru = jnp.concatenate([p['bih'][:, :2 * H] + p['bhh'][:, :2 * H],
                             p['bih'][:, 2 * H:], p['bhh'][:, 2 * H:]], axis=1)  # (1, 4H)

    # fused output head: h_new -> [q_normal padded to 64 | qa(64)]
    wn_pad = jnp.zeros((H, H), jnp.float32).at[:, :N_NORMAL].set(p['wn'])
    w_head = jnp.concatenate([wn_pad, p['wq2']], axis=1)                         # (H, 2H)
    b_head = jnp.concatenate(
        [jnp.zeros((1, H), jnp.float32).at[:, :N_NORMAL].set(p['bn']),
         jnp.zeros((1, H), jnp.float32)], axis=1)                                # (1, 2H)

    # per-enemy reduce + (SCALE/N_HEAD) scale + column placement into the 64-lane Q half
    int_sel = np.zeros((n_enemies * H, H), np.float32)
    for j in range(n_enemies):
        int_sel[j * H:(j + 1) * H, N_NORMAL + j] = SCALE / N_HEAD
    int_sel = jnp.asarray(int_sel)

    bf = lambda w: w.astype(bf16)
    return [bf(w_own_f), b_own_f, bf(w_ally_f), b_ally_f, bf(w_enemy_f), b_enemy_f,
            bf(head_sel), bf(w_gru), b_gru, bf(w_head), b_head, bf(int_sel)]


def ss_rnn_forward(params, inputs, hidden_state, *, tile_b=256):
    bs, own_feats, ally_feats, enemy_feats, embedding_indices = inputs
    del embedding_indices        # obs_agent_id / obs_last_action are False in this config
    B, _, own_dim = own_feats.shape
    n_allies, ally_dim = ally_feats.shape[1], ally_feats.shape[2]
    n_enemies, enemy_dim = enemy_feats.shape[1], enemy_feats.shape[2]
    n_agents = n_allies + 1
    n_q = N_NORMAL + n_enemies
    E = 1 + n_allies + n_enemies
    assert n_q <= HIDDEN        # Q values and h_new share one 128-lane output slab

    tile_b = min(tile_b, B)
    # >=2 grid steps only where it pays: dual-TensorCore (v7x) megacore sharding.
    if _dual_tensorcore() and tile_b == B and B % 16 == 0:
        tile_b = B // 2
    assert B % tile_b == 0 and tile_b % 8 == 0, (B, tile_b)

    own2d = own_feats[:, 0, :]                              # (B, own_dim)
    allyT = jnp.transpose(ally_feats, (1, 0, 2))            # (n_allies, B, ally_dim), entity-major
    enemyT = jnp.transpose(enemy_feats, (1, 0, 2))          # (n_enemies, B, enemy_dim)
    h_in = hidden_state.reshape(-1, HIDDEN)                 # (B, H)

    weights = _fuse_params(params, n_enemies)               # in production: precompute once

    # Rough f32 live-intermediate bound per grid step; raise the scoped VMEM limit only
    # when needed and keep it under v7x's 64 MiB physical capacity.
    vmem_est = 4 * tile_b * (E * 3 * HIDDEN + (E + 12) * 2 * HIDDEN)
    vmem_limit = None
    if vmem_est > 24 * (1 << 20):
        vmem_limit = min(2 * vmem_est, 60 * (1 << 20))

    def rep(w):
        nd = w.ndim
        return pl.BlockSpec(w.shape, lambda i, _n=nd: (0,) * _n)

    in_specs = [
        pl.BlockSpec((tile_b, own_dim), lambda i: (i, 0)),
        pl.BlockSpec((n_allies, tile_b, ally_dim), lambda i: (0, i, 0)),
        pl.BlockSpec((n_enemies, tile_b, enemy_dim), lambda i: (0, i, 0)),
        pl.BlockSpec((tile_b, HIDDEN), lambda i: (i, 0)),
    ] + [rep(w) for w in weights]

    out = pl.pallas_call(
        _make_kernel(n_allies, n_enemies, tile_b),
        grid=(B // tile_b,),
        in_specs=in_specs,
        out_specs=pl.BlockSpec((tile_b, OUT_W), lambda i: (i, 0)),
        out_shape=jax.ShapeDtypeStruct((B, OUT_W), jnp.float32),
        compiler_params=pltpu.CompilerParams(
            dimension_semantics=("parallel",),
            vmem_limit_bytes=vmem_limit),
    )(own2d, allyT, enemyT, h_in, *weights)

    q_total = out[:, :n_q].reshape(B, 1, n_q)               # (bs*n_agents, 1, n_normal + n_enemies)
    h_out = out[:, HIDDEN:OUT_W].reshape(bs, n_agents, HIDDEN)
    return q_total, h_out


def reference_forward(params, inputs, hidden_state):
    """Pure-JAX f32 reference mirroring the PyTorch forward (SAQA + sc2 path)."""
    bs, own_feats, ally_feats, enemy_feats, _ = inputs
    p = params
    B = own_feats.shape[0]
    n_allies, n_enemies = ally_feats.shape[1], enemy_feats.shape[1]
    n_agents = n_allies + 1
    H, nh, dh = HIDDEN, N_HEAD, D_HEAD

    own_e = own_feats[:, 0, :] @ p['w_own'] + p['b_own']
    ally_e = jnp.einsum('bnd,dh->bnh', ally_feats, p['w_ally']) + p['b_ally']
    enemy_e = jnp.einsum('bnd,dh->bnh', enemy_feats, p['w_enemy']) + p['b_enemy']
    emb = jnp.concatenate([own_e[:, None, :], ally_e, enemy_e], axis=1)     # (B, E, H)

    q = (own_e @ p['wq']).reshape(B, nh, dh)
    k = jnp.einsum('beh,hk->bek', emb, p['wk']).reshape(B, -1, nh, dh)
    v = jnp.einsum('beh,hk->bek', emb, p['wv']).reshape(B, -1, nh, dh)
    attn = jax.nn.softmax(jnp.einsum('bhd,behd->bhe', q, k) * SCALE, axis=-1)
    action_query = jnp.einsum('bhe,behd->bhd', attn, v).reshape(B, H)

    h_prev = hidden_state.reshape(-1, H)
    gx = action_query @ p['wih'] + p['bih']
    gh = h_prev @ p['whh'] + p['bhh']
    r = jax.nn.sigmoid(gx[:, :H] + gh[:, :H])
    z = jax.nn.sigmoid(gx[:, H:2 * H] + gh[:, H:2 * H])
    n = jnp.tanh(gx[:, 2 * H:] + r * gh[:, 2 * H:])
    h_new = (1.0 - z) * n + z * h_prev

    q_normal = h_new @ p['wn'] + p['bn']
    qa = (h_new @ p['wq2']).reshape(B, nh, dh)
    ka = jnp.einsum('beh,hk->bek', emb[:, n_agents:], p['wk2']).reshape(B, n_enemies, nh, dh)
    q_interact = jnp.mean(jnp.einsum('bhd,behd->bhe', qa, ka) * SCALE, axis=1)

    q_total = jnp.concatenate([q_normal, q_interact], axis=-1)[:, None, :]
    return q_total, h_new.reshape(bs, n_agents, H)


if __name__ == "__main__":
    key = jax.random.PRNGKey(0)
    bs, n_agents = 8, 4
    n_allies, n_enemies = n_agents - 1, 5
    own_dim, ally_dim, enemy_dim = 10, 12, 14
    B = bs * n_agents

    k1, k2, k3, k4, kp = jax.random.split(key, 5)
    own_feats = jax.random.normal(k1, (B, 1, own_dim), jnp.float32)
    ally_feats = jax.random.normal(k2, (B, n_allies, ally_dim), jnp.float32)
    enemy_feats = jax.random.normal(k3, (B, n_enemies, enemy_dim), jnp.float32)
    hidden_state = jax.random.normal(k4, (bs, n_agents, HIDDEN), jnp.float32) * 0.1
    embedding_indices = [None]           # unused (obs_agent_id / obs_last_action = False)

    params = init_params(kp, own_dim, ally_dim, enemy_dim)
    inputs = (bs, own_feats, ally_feats, enemy_feats, embedding_indices)

    q_total, h_out = ss_rnn_forward(params, inputs, hidden_state)
    jax.block_until_ready((q_total, h_out))

    q_ref, h_ref = reference_forward(params, inputs, hidden_state)
    assert q_total.shape == (B, 1, N_NORMAL + n_enemies), q_total.shape
    assert h_out.shape == (bs, n_agents, HIDDEN), h_out.shape
    # tolerance accounts for bf16 MXU operands and pl.reciprocal(approx=True) in the softmax
    assert float(jnp.max(jnp.abs(q_total - q_ref))) < 3e-2
    assert float(jnp.max(jnp.abs(h_out - h_ref))) < 3e-2
    print("KERNEL_OK")
</pallas_src>

<mosaic_0001>
module attributes {stable_mosaic.version = 11 : i64} {
  func.func @kernel(%arg0: i32, %arg1: memref<32x10xf32, #tpu.memory_space<vmem>>, %arg2: memref<3x32x12xf32, #tpu.memory_space<vmem>>, %arg3: memref<5x32x14xf32, #tpu.memory_space<vmem>>, %arg4: memref<32x64xf32, #tpu.memory_space<vmem>>, %arg5: memref<10x192xbf16, #tpu.memory_space<vmem>>, %arg6: memref<1x192xf32, #tpu.memory_space<vmem>>, %arg7: memref<12x128xbf16, #tpu.memory_space<vmem>>, %arg8: memref<1x128xf32, #tpu.memory_space<vmem>>, %arg9: memref<14x192xbf16, #tpu.memory_space<vmem>>, %arg10: memref<1x192xf32, #tpu.memory_space<vmem>>, %arg11: memref<64x128xbf16, #tpu.memory_space<vmem>>, %arg12: memref<128x256xbf16, #tpu.memory_space<vmem>>, %arg13: memref<1x256xf32, #tpu.memory_space<vmem>>, %arg14: memref<64x128xbf16, #tpu.memory_space<vmem>>, %arg15: memref<1x128xf32, #tpu.memory_space<vmem>>, %arg16: memref<320x64xbf16, #tpu.memory_space<vmem>>, %arg17: memref<32x128xf32, #tpu.memory_space<vmem>>) attributes {dimension_semantics = [#tpu.dimension_semantics<parallel>], iteration_bounds = array<i64: 1>, scalar_prefetch = 0 : i64, scratch_operands = 0 : i64, tpu.core_type = #tpu.core_type<tc>, window_params = [{transform_indices = @transform_0, window_bounds = array<i64: 32, 10>}, {transform_indices = @transform_1, window_bounds = array<i64: 3, 32, 12>}, {transform_indices = @transform_2, window_bounds = array<i64: 5, 32, 14>}, {transform_indices = @transform_3, window_bounds = array<i64: 32, 64>}, {pipeline_mode = #tpu.pipeline_mode<synchronous>, transform_indices = @transform_4, window_bounds = array<i64: 10, 192>}, {pipeline_mode = #tpu.pipeline_mode<synchronous>, transform_indices = @transform_5, window_bounds = array<i64: 1, 192>}, {pipeline_mode = #tpu.pipeline_mode<synchronous>, transform_indices = @transform_6, window_bounds = array<i64: 12, 128>}, {pipeline_mode = #tpu.pipeline_mode<synchronous>, transform_indices = @transform_7, window_bounds = array<i64: 1, 128>}, {pipeline_mode = #tpu.pipeline_mode<synchronous>, transform_indices = @transform_8, window_bounds = array<i64: 14, 192>}, {pipeline_mode = #tpu.pipeline_mode<synchronous>, transform_indices = @transform_9, window_bounds = array<i64: 1, 192>}, {pipeline_mode = #tpu.pipeline_mode<synchronous>, transform_indices = @transform_10, window_bounds = array<i64: 64, 128>}, {pipeline_mode = #tpu.pipeline_mode<synchronous>, transform_indices = @transform_11, window_bounds = array<i64: 128, 256>}, {pipeline_mode = #tpu.pipeline_mode<synchronous>, transform_indices = @transform_12, window_bounds = array<i64: 1, 256>}, {pipeline_mode = #tpu.pipeline_mode<synchronous>, transform_indices = @transform_13, window_bounds = array<i64: 64, 128>}, {pipeline_mode = #tpu.pipeline_mode<synchronous>, transform_indices = @transform_14, window_bounds = array<i64: 1, 128>}, {pipeline_mode = #tpu.pipeline_mode<synchronous>, transform_indices = @transform_15, window_bounds = array<i64: 320, 64>}, {transform_indices = @transform_16, window_bounds = array<i64: 32, 128>}]} {
    %c0 = arith.constant 0 : index
    %c0_0 = arith.constant 0 : index
    %0 = vector.load %arg1[%c0, %c0_0] : memref<32x10xf32, #tpu.memory_space<vmem>>, vector<32x10xf32>
    %c0_1 = arith.constant 0 : index
    %c0_2 = arith.constant 0 : index
    %1 = vector.load %arg5[%c0_1, %c0_2] : memref<10x192xbf16, #tpu.memory_space<vmem>>, vector<10x192xbf16>
    %2 = arith.truncf %0 : vector<32x10xf32> to vector<32x10xbf16>
    %cst = arith.constant dense<0.000000e+00> : vector<32x192xf32>
    %3 = tpu.matmul %2, %1, %cst {dimension_numbers = #tpu.dot_dimension_numbers<[1], [0], [0], [1], [0, 0, 1, 1], [], []>} : vector<32x10xbf16>, vector<10x192xbf16>, vector<32x192xf32> -> vector<32x192xf32>
    %c0_3 = arith.constant 0 : index
    %c0_4 = arith.constant 0 : index
    %4 = vector.load %arg6[%c0_3, %c0_4] : memref<1x192xf32, #tpu.memory_space<vmem>>, vector<1x192xf32>
    %5 = vector.broadcast %4 : vector<1x192xf32> to vector<32x192xf32>
    %6 = arith.addf %3, %5 : vector<32x192xf32>
    %c0_5 = arith.constant 0 : index
    %c0_6 = arith.constant 0 : index
    %c0_7 = arith.constant 0 : index
    %7 = vector.load %arg2[%c0_5, %c0_6, %c0_7] : memref<3x32x12xf32, #tpu.memory_space<vmem>>, vector<3x32x12xf32>
    %8 = vector.shape_cast %7 : vector<3x32x12xf32> to vector<96x12xf32>
    %c0_8 = arith.constant 0 : index
    %c0_9 = arith.constant 0 : index
    %9 = vector.load %arg7[%c0_8, %c0_9] : memref<12x128xbf16, #tpu.memory_space<vmem>>, vector<12x128xbf16>
    %10 = arith.truncf %8 : vector<96x12xf32> to vector<96x12xbf16>
    %cst_10 = arith.constant dense<0.000000e+00> : vector<96x128xf32>
    %11 = tpu.matmul %10, %9, %cst_10 {dimension_numbers = #tpu.dot_dimension_numbers<[1], [0], [0], [1], [0, 0, 1, 1], [], []>} : vector<96x12xbf16>, vector<12x128xbf16>, vector<96x128xf32> -> vector<96x128xf32>
    %c0_11 = arith.constant 0 : index
    %c0_12 = arith.constant 0 : index
    %12 = vector.load %arg8[%c0_11, %c0_12] : memref<1x128xf32, #tpu.memory_space<vmem>>, vector<1x128xf32>
    %13 = vector.broadcast %12 : vector<1x128xf32> to vector<96x128xf32>
    %14 = arith.addf %11, %13 : vector<96x128xf32>
    %c0_13 = arith.constant 0 : index
    %c0_14 = arith.constant 0 : index
    %c0_15 = arith.constant 0 : index
    %15 = vector.load %arg3[%c0_13, %c0_14, %c0_15] : memref<5x32x14xf32, #tpu.memory_space<vmem>>, vector<5x32x14xf32>
    %16 = vector.shape_cast %15 : vector<5x32x14xf32> to vector<160x14xf32>
    %c0_16 = arith.constant 0 : index
    %c0_17 = arith.constant 0 : index
    %17 = vector.load %arg9[%c0_16, %c0_17] : memref<14x192xbf16, #tpu.memory_space<vmem>>, vector<14x192xbf16>
    %18 = arith.truncf %16 : vector<160x14xf32> to vector<160x14xbf16>
    %cst_18 = arith.constant dense<0.000000e+00> : vector<160x192xf32>
    %19 = tpu.matmul %18, %17, %cst_18 {dimension_numbers = #tpu.dot_dimension_numbers<[1], [0], [0], [1], [0, 0, 1, 1], [], []>} : vector<160x14xbf16>, vector<14x192xbf16>, vector<160x192xf32> -> vector<160x192xf32>
    %c0_19 = arith.constant 0 : index
    %c0_20 = arith.constant 0 : index
    %20 = vector.load %arg10[%c0_19, %c0_20] : memref<1x192xf32, #tpu.memory_space<vmem>>, vector<1x192xf32>
    %21 = vector.broadcast %20 : vector<1x192xf32> to vector<160x192xf32>
    %22 = arith.addf %19, %21 : vector<160x192xf32>
    %23 = vector.extract_strided_slice %6 {offsets = [0, 128], sizes = [32, 64], strides = [1, 1]} : vector<32x192xf32> to vector<32x64xf32>
    %24 = vector.extract_strided_slice %6 {offsets = [0, 0], sizes = [32, 128], strides = [1, 1]} : vector<32x192xf32> to vector<32x128xf32>
    %25 = vector.extract_strided_slice %14 {offsets = [0, 0], sizes = [32, 128], strides = [1, 1]} : vector<96x128xf32> to vector<32x128xf32>
    %26 = vector.extract_strided_slice %14 {offsets = [32, 0], sizes = [32, 128], strides = [1, 1]} : vector<96x128xf32> to vector<32x128xf32>
    %27 = vector.extract_strided_slice %14 {offsets = [64, 0], sizes = [32, 128], strides = [1, 1]} : vector<96x128xf32> to vector<32x128xf32>
    %28 = vector.extract_strided_slice %22 {offsets = [0, 0], sizes = [32, 128], strides = [1, 1]} : vector<160x192xf32> to vector<32x128xf32>
    %29 = vector.extract_strided_slice %22 {offsets = [32, 0], sizes = [32, 128], strides = [1, 1]} : vector<160x192xf32> to vector<32x128xf32>
    %30 = vector.extract_strided_slice %22 {offsets = [64, 0], sizes = [32, 128], strides = [1, 1]} : vector<160x192xf32> to vector<32x128xf32>
    %31 = vector.extract_strided_slice %22 {offsets = [96, 0], sizes = [32, 128], strides = [1, 1]} : vector<160x192xf32> to vector<32x128xf32>
    %32 = vector.extract_strided_slice %22 {offsets = [128, 0], sizes = [32, 128], strides = [1, 1]} : vector<160x192xf32> to vector<32x128xf32>
    %33 = vector.extract_strided_slice %24 {offsets = [0, 0], sizes = [32, 64], strides = [1, 1]} : vector<32x128xf32> to vector<32x64xf32>
    %34 = arith.mulf %23, %33 : vector<32x64xf32>
    %c0_21 = arith.constant 0 : index
    %c0_22 = arith.constant 0 : index
    %35 = vector.load %arg11[%c0_21, %c0_22] : memref<64x128xbf16, #tpu.memory_space<vmem>>, vector<64x128xbf16>
    %36 = arith.truncf %34 : vector<32x64xf32> to vector<32x64xbf16>
    %cst_23 = arith.constant dense<0.000000e+00> : vector<32x128xf32>
    %37 = tpu.matmul %36, %35, %cst_23 {dimension_numbers = #tpu.dot_dimension_numbers<[1], [0], [0], [1], [0, 0, 1, 1], [], []>} : vector<32x64xbf16>, vector<64x128xbf16>, vector<32x128xf32> -> vector<32x128xf32>
    %38 = vector.extract_strided_slice %25 {offsets = [0, 0], sizes = [32, 64], strides = [1, 1]} : vector<32x128xf32> to vector<32x64xf32>
    %39 = arith.mulf %23, %38 : vector<32x64xf32>
    %c0_24 = arith.constant 0 : index
    %c0_25 = arith.constant 0 : index
    %40 = vector.load %arg11[%c0_24, %c0_25] : memref<64x128xbf16, #tpu.memory_space<vmem>>, vector<64x128xbf16>
    %41 = arith.truncf %39 : vector<32x64xf32> to vector<32x64xbf16>
    %cst_26 = arith.constant dense<0.000000e+00> : vector<32x128xf32>
    %42 = tpu.matmul %41, %40, %cst_26 {dimension_numbers = #tpu.dot_dimension_numbers<[1], [0], [0], [1], [0, 0, 1, 1], [], []>} : vector<32x64xbf16>, vector<64x128xbf16>, vector<32x128xf32> -> vector<32x128xf32>
    %43 = vector.extract_strided_slice %26 {offsets = [0, 0], sizes = [32, 64], strides = [1, 1]} : vector<32x128xf32> to vector<32x64xf32>
    %44 = arith.mulf %23, %43 : vector<32x64xf32>
    %c0_27 = arith.constant 0 : index
    %c0_28 = arith.constant 0 : index
    %45 = vector.load %arg11[%c0_27, %c0_28] : memref<64x128xbf16, #tpu.memory_space<vmem>>, vector<64x128xbf16>
    %46 = arith.truncf %44 : vector<32x64xf32> to vector<32x64xbf16>
    %cst_29 = arith.constant dense<0.000000e+00> : vector<32x128xf32>
    %47 = tpu.matmul %46, %45, %cst_29 {dimension_numbers = #tpu.dot_dimension_numbers<[1], [0], [0], [1], [0, 0, 1, 1], [], []>} : vector<32x64xbf16>, vector<64x128xbf16>, vector<32x128xf32> -> vector<32x128xf32>
    %48 = vector.extract_strided_slice %27 {offsets = [0, 0], sizes = [32, 64], strides = [1, 1]} : vector<32x128xf32> to vector<32x64xf32>
    %49 = arith.mulf %23, %48 : vector<32x64xf32>
    %c0_30 = arith.constant 0 : index
    %c0_31 = arith.constant 0 : index
    %50 = vector.load %arg11[%c0_30, %c0_31] : memref<64x128xbf16, #tpu.memory_space<vmem>>, vector<64x128xbf16>
    %51 = arith.truncf %49 : vector<32x64xf32> to vector<32x64xbf16>
    %cst_32 = arith.constant dense<0.000000e+00> : vector<32x128xf32>
    %52 = tpu.matmul %51, %50, %cst_32 {dimension_numbers = #tpu.dot_dimension_numbers<[1], [0], [0], [1], [0, 0, 1, 1], [], []>} : vector<32x64xbf16>, vector<64x128xbf16>, vector<32x128xf32> -> vector<32x128xf32>
    %53 = vector.extract_strided_slice %28 {offsets = [0, 0], sizes = [32, 64], strides = [1, 1]} : vector<32x128xf32> to vector<32x64xf32>
    %54 = arith.mulf %23, %53 : vector<32x64xf32>
    %c0_33 = arith.constant 0 : index
    %c0_34 = arith.constant 0 : index
    %55 = vector.load %arg11[%c0_33, %c0_34] : memref<64x128xbf16, #tpu.memory_space<vmem>>, vector<64x128xbf16>
    %56 = arith.truncf %54 : vector<32x64xf32> to vector<32x64xbf16>
    %cst_35 = arith.constant dense<0.000000e+00> : vector<32x128xf32>
    %57 = tpu.matmul %56, %55, %cst_35 {dimension_numbers = #tpu.dot_dimension_numbers<[1], [0], [0], [1], [0, 0, 1, 1], [], []>} : vector<32x64xbf16>, vector<64x128xbf16>, vector<32x128xf32> -> vector<32x128xf32>
    %58 = vector.extract_strided_slice %29 {offsets = [0, 0], sizes = [32, 64], strides = [1, 1]} : vector<32x128xf32> to vector<32x64xf32>
    %59 = arith.mulf %23, %58 : vector<32x64xf32>
    %c0_36 = arith.constant 0 : index
    %c0_37 = arith.constant 0 : index
    %60 = vector.load %arg11[%c0_36, %c0_37] : memref<64x128xbf16, #tpu.memory_space<vmem>>, vector<64x128xbf16>
    %61 = arith.truncf %59 : vector<32x64xf32> to vector<32x64xbf16>
    %cst_38 = arith.constant dense<0.000000e+00> : vector<32x128xf32>
    %62 = tpu.matmul %61, %60, %cst_38 {dimension_numbers = #tpu.dot_dimension_numbers<[1], [0], [0], [1], [0, 0, 1, 1], [], []>} : vector<32x64xbf16>, vector<64x128xbf16>, vector<32x128xf32> -> vector<32x128xf32>
    %63 = vector.extract_strided_slice %30 {offsets = [0, 0], sizes = [32, 64], strides = [1, 1]} : vector<32x128xf32> to vector<32x64xf32>
    %64 = arith.mulf %23, %63 : vector<32x64xf32>
    %c0_39 = arith.constant 0 : index
    %c0_40 = arith.constant 0 : index
    %65 = vector.load %arg11[%c0_39, %c0_40] : memref<64x128xbf16, #tpu.memory_space<vmem>>, vector<64x128xbf16>
    %66 = arith.truncf %64 : vector<32x64xf32> to vector<32x64xbf16>
    %cst_41 = arith.constant dense<0.000000e+00> : vector<32x128xf32>
    %67 = tpu.matmul %66, %65, %cst_41 {dimension_numbers = #tpu.dot_dimension_numbers<[1], [0], [0], [1], [0, 0, 1, 1], [], []>} : vector<32x64xbf16>, vector<64x128xbf16>, vector<32x128xf32> -> vector<32x128xf32>
    %68 = vector.extract_strided_slice %31 {offsets = [0, 0], sizes = [32, 64], strides = [1, 1]} : vector<32x128xf32> to vector<32x64xf32>
    %69 = arith.mulf %23, %68 : vector<32x64xf32>
    %c0_42 = arith.constant 0 : index
    %c0_43 = arith.constant 0 : index
    %70 = vector.load %arg11[%c0_42, %c0_43] : memref<64x128xbf16, #tpu.memory_space<vmem>>, vector<64x128xbf16>
    %71 = arith.truncf %69 : vector<32x64xf32> to vector<32x64xbf16>
    %cst_44 = arith.constant dense<0.000000e+00> : vector<32x128xf32>
    %72 = tpu.matmul %71, %70, %cst_44 {dimension_numbers = #tpu.dot_dimension_numbers<[1], [0], [0], [1], [0, 0, 1, 1], [], []>} : vector<32x64xbf16>, vector<64x128xbf16>, vector<32x128xf32> -> vector<32x128xf32>
    %73 = vector.extract_strided_slice %32 {offsets = [0, 0], sizes = [32, 64], strides = [1, 1]} : vector<32x128xf32> to vector<32x64xf32>
    %74 = arith.mulf %23, %73 : vector<32x64xf32>
    %c0_45 = arith.constant 0 : index
    %c0_46 = arith.constant 0 : index
    %75 = vector.load %arg11[%c0_45, %c0_46] : memref<64x128xbf16, #tpu.memory_space<vmem>>, vector<64x128xbf16>
    %76 = arith.truncf %74 : vector<32x64xf32> to vector<32x64xbf16>
    %cst_47 = arith.constant dense<0.000000e+00> : vector<32x128xf32>
    %77 = tpu.matmul %76, %75, %cst_47 {dimension_numbers = #tpu.dot_dimension_numbers<[1], [0], [0], [1], [0, 0, 1, 1], [], []>} : vector<32x64xbf16>, vector<64x128xbf16>, vector<32x128xf32> -> vector<32x128xf32>
    %78 = arith.maximumf %37, %42 : vector<32x128xf32>
    %79 = arith.maximumf %78, %47 : vector<32x128xf32>
    %80 = arith.maximumf %79, %52 : vector<32x128xf32>
    %81 = arith.maximumf %80, %57 : vector<32x128xf32>
    %82 = arith.maximumf %81, %62 : vector<32x128xf32>
    %83 = arith.maximumf %82, %67 : vector<32x128xf32>
    %84 = arith.maximumf %83, %72 : vector<32x128xf32>
    %85 = arith.maximumf %84, %77 : vector<32x128xf32>
    %86 = arith.subf %37, %85 : vector<32x128xf32>
    %87 = math.exp %86 : vector<32x128xf32>
    %88 = arith.mulf %87, %24 : vector<32x128xf32>
    %89 = arith.subf %42, %85 : vector<32x128xf32>
    %90 = math.exp %89 : vector<32x128xf32>
    %91 = arith.addf %87, %90 : vector<32x128xf32>
    %92 = arith.mulf %90, %25 : vector<32x128xf32>
    %93 = arith.addf %88, %92 : vector<32x128xf32>
    %94 = arith.subf %47, %85 : vector<32x128xf32>
    %95 = math.exp %94 : vector<32x128xf32>
    %96 = arith.addf %91, %95 : vector<32x128xf32>
    %97 = arith.mulf %95, %26 : vector<32x128xf32>
    %98 = arith.addf %93, %97 : vector<32x128xf32>
    %99 = arith.subf %52, %85 : vector<32x128xf32>
    %100 = math.exp %99 : vector<32x128xf32>
    %101 = arith.addf %96, %100 : vector<32x128xf32>
    %102 = arith.mulf %100, %27 : vector<32x128xf32>
    %103 = arith.addf %98, %102 : vector<32x128xf32>
    %104 = arith.subf %57, %85 : vector<32x128xf32>
    %105 = math.exp %104 : vector<32x128xf32>
    %106 = arith.addf %101, %105 : vector<32x128xf32>
    %107 = arith.mulf %105, %28 : vector<32x128xf32>
    %108 = arith.addf %103, %107 : vector<32x128xf32>
    %109 = arith.subf %62, %85 : vector<32x128xf32>
    %110 = math.exp %109 : vector<32x128xf32>
    %111 = arith.addf %106, %110 : vector<32x128xf32>
    %112 = arith.mulf %110, %29 : vector<32x128xf32>
    %113 = arith.addf %108, %112 : vector<32x128xf32>
    %114 = arith.subf %67, %85 : vector<32x128xf32>
    %115 = math.exp %114 : vector<32x128xf32>
    %116 = arith.addf %111, %115 : vector<32x128xf32>
    %117 = arith.mulf %115, %30 : vector<32x128xf32>
    %118 = arith.addf %113, %117 : vector<32x128xf32>
    %119 = arith.subf %72, %85 : vector<32x128xf32>
    %120 = math.exp %119 : vector<32x128xf32>
    %121 = arith.addf %116, %120 : vector<32x128xf32>
    %122 = arith.mulf %120, %31 : vector<32x128xf32>
    %123 = arith.addf %118, %122 : vector<32x128xf32>
    %124 = arith.subf %77, %85 : vector<32x128xf32>
    %125 = math.exp %124 : vector<32x128xf32>
    %126 = arith.addf %121, %125 : vector<32x128xf32>
    %127 = arith.mulf %125, %32 : vector<32x128xf32>
    %128 = arith.addf %123, %127 : vector<32x128xf32>
    %129 = tpu.reciprocal %126 {approx = true} : vector<32x128xf32> -> vector<32x128xf32>
    %130 = arith.mulf %128, %129 : vector<32x128xf32>
    %131 = vector.extract_strided_slice %130 {offsets = [0, 64], sizes = [32, 64], strides = [1, 1]} : vector<32x128xf32> to vector<32x64xf32>
    %c0_48 = arith.constant 0 : index
    %c0_49 = arith.constant 0 : index
    %132 = vector.load %arg4[%c0_48, %c0_49] : memref<32x64xf32, #tpu.memory_space<vmem>>, vector<32x64xf32>
    %133 = tpu.concatenate %131, %132 in 1 : vector<32x64xf32>, vector<32x64xf32> -> vector<32x128xf32>
    %c0_50 = arith.constant 0 : index
    %c0_51 = arith.constant 0 : index
    %134 = vector.load %arg12[%c0_50, %c0_51] : memref<128x256xbf16, #tpu.memory_space<vmem>>, vector<128x256xbf16>
    %135 = arith.truncf %133 : vector<32x128xf32> to vector<32x128xbf16>
    %cst_52 = arith.constant dense<0.000000e+00> : vector<32x256xf32>
    %136 = tpu.matmul %135, %134, %cst_52 {dimension_numbers = #tpu.dot_dimension_numbers<[1], [0], [0], [1], [0, 0, 1, 1], [], []>} : vector<32x128xbf16>, vector<128x256xbf16>, vector<32x256xf32> -> vector<32x256xf32>
    %c0_53 = arith.constant 0 : index
    %c0_54 = arith.constant 0 : index
    %137 = vector.load %arg13[%c0_53, %c0_54] : memref<1x256xf32, #tpu.memory_space<vmem>>, vector<1x256xf32>
    %138 = vector.broadcast %137 : vector<1x256xf32> to vector<32x256xf32>
    %139 = arith.addf %136, %138 : vector<32x256xf32>
    %140 = vector.extract_strided_slice %139 {offsets = [0, 0], sizes = [32, 64], strides = [1, 1]} : vector<32x256xf32> to vector<32x64xf32>
    %141 = arith.negf %140 : vector<32x64xf32>
    %142 = math.exp %141 : vector<32x64xf32>
    %cst_55 = arith.constant 1.000000e+00 : f32
    %143 = vector.broadcast %cst_55 : f32 to vector<32x64xf32>
    %144 = arith.addf %143, %142 : vector<32x64xf32>
    %145 = arith.divf %143, %144 : vector<32x64xf32>
    %146 = vector.extract_strided_slice %139 {offsets = [0, 64], sizes = [32, 64], strides = [1, 1]} : vector<32x256xf32> to vector<32x64xf32>
    %147 = arith.negf %146 : vector<32x64xf32>
    %148 = math.exp %147 : vector<32x64xf32>
    %cst_56 = arith.constant 1.000000e+00 : f32
    %149 = vector.broadcast %cst_56 : f32 to vector<32x64xf32>
    %150 = arith.addf %149, %148 : vector<32x64xf32>
    %151 = arith.divf %149, %150 : vector<32x64xf32>
    %152 = vector.extract_strided_slice %139 {offsets = [0, 128], sizes = [32, 64], strides = [1, 1]} : vector<32x256xf32> to vector<32x64xf32>
    %153 = vector.extract_strided_slice %139 {offsets = [0, 192], sizes = [32, 64], strides = [1, 1]} : vector<32x256xf32> to vector<32x64xf32>
    %154 = arith.mulf %145, %153 : vector<32x64xf32>
    %155 = arith.addf %152, %154 : vector<32x64xf32>
    %156 = math.tanh %155 : vector<32x64xf32>
    %cst_57 = arith.constant 1.000000e+00 : f32
    %157 = vector.broadcast %cst_57 : f32 to vector<32x64xf32>
    %158 = arith.subf %157, %151 : vector<32x64xf32>
    %159 = arith.mulf %158, %156 : vector<32x64xf32>
    %160 = arith.mulf %151, %132 : vector<32x64xf32>
    %161 = arith.addf %159, %160 : vector<32x64xf32>
    %c0_58 = arith.constant 0 : index
    %c0_59 = arith.constant 0 : index
    %162 = vector.load %arg14[%c0_58, %c0_59] : memref<64x128xbf16, #tpu.memory_space<vmem>>, vector<64x128xbf16>
    %163 = arith.truncf %161 : vector<32x64xf32> to vector<32x64xbf16>
    %cst_60 = arith.constant dense<0.000000e+00> : vector<32x128xf32>
    %164 = tpu.matmul %163, %162, %cst_60 {dimension_numbers = #tpu.dot_dimension_numbers<[1], [0], [0], [1], [0, 0, 1, 1], [], []>} : vector<32x64xbf16>, vector<64x128xbf16>, vector<32x128xf32> -> vector<32x128xf32>
    %c0_61 = arith.constant 0 : index
    %c0_62 = arith.constant 0 : index
    %165 = vector.load %arg15[%c0_61, %c0_62] : memref<1x128xf32, #tpu.memory_space<vmem>>, vector<1x128xf32>
    %166 = vector.broadcast %165 : vector<1x128xf32> to vector<32x128xf32>
    %167 = arith.addf %164, %166 : vector<32x128xf32>
    %168 = vector.extract_strided_slice %167 {offsets = [0, 0], sizes = [32, 64], strides = [1, 1]} : vector<32x128xf32> to vector<32x64xf32>
    %169 = vector.extract_strided_slice %167 {offsets = [0, 64], sizes = [32, 64], strides = [1, 1]} : vector<32x128xf32> to vector<32x64xf32>
    %170 = vector.extract_strided_slice %22 {offsets = [0, 128], sizes = [32, 64], strides = [1, 1]} : vector<160x192xf32> to vector<32x64xf32>
    %171 = arith.mulf %169, %170 : vector<32x64xf32>
    %c0_63 = arith.constant 0 : index
    %c0_64 = arith.constant 0 : index
    %172 = vector.load %arg16[%c0_63, %c0_64] : memref<320x64xbf16, #tpu.memory_space<vmem>>, vector<64x64xbf16>
    %173 = arith.truncf %171 : vector<32x64xf32> to vector<32x64xbf16>
    %cst_65 = arith.constant dense<0.000000e+00> : vector<32x64xf32>
    %174 = tpu.matmul %173, %172, %cst_65 {dimension_numbers = #tpu.dot_dimension_numbers<[1], [0], [0], [1], [0, 0, 1, 1], [], []>} : vector<32x64xbf16>, vector<64x64xbf16>, vector<32x64xf32> -> vector<32x64xf32>
    %175 = arith.addf %168, %174 : vector<32x64xf32>
    %176 = vector.extract_strided_slice %22 {offsets = [32, 128], sizes = [32, 64], strides = [1, 1]} : vector<160x192xf32> to vector<32x64xf32>
    %177 = arith.mulf %169, %176 : vector<32x64xf32>
    %c64 = arith.constant 64 : index
    %c0_66 = arith.constant 0 : index
    %178 = vector.load %arg16[%c64, %c0_66] : memref<320x64xbf16, #tpu.memory_space<vmem>>, vector<64x64xbf16>
    %179 = arith.truncf %177 : vector<32x64xf32> to vector<32x64xbf16>
    %cst_67 = arith.constant dense<0.000000e+00> : vector<32x64xf32>
    %180 = tpu.matmul %179, %178, %cst_67 {dimension_numbers = #tpu.dot_dimension_numbers<[1], [0], [0], [1], [0, 0, 1, 1], [], []>} : vector<32x64xbf16>, vector<64x64xbf16>, vector<32x64xf32> -> vector<32x64xf32>
    %181 = arith.addf %175, %180 : vector<32x64xf32>
    %182 = vector.extract_strided_slice %22 {offsets = [64, 128], sizes = [32, 64], strides = [1, 1]} : vector<160x192xf32> to vector<32x64xf32>
    %183 = arith.mulf %169, %182 : vector<32x64xf32>
    %c128 = arith.constant 128 : index
    %c0_68 = arith.constant 0 : index
    %184 = vector.load %arg16[%c128, %c0_68] : memref<320x64xbf16, #tpu.memory_space<vmem>>, vector<64x64xbf16>
    %185 = arith.truncf %183 : vector<32x64xf32> to vector<32x64xbf16>
    %cst_69 = arith.constant dense<0.000000e+00> : vector<32x64xf32>
    %186 = tpu.matmul %185, %184, %cst_69 {dimension_numbers = #tpu.dot_dimension_numbers<[1], [0], [0], [1], [0, 0, 1, 1], [], []>} : vector<32x64xbf16>, vector<64x64xbf16>, vector<32x64xf32> -> vector<32x64xf32>
    %187 = arith.addf %181, %186 : vector<32x64xf32>
    %188 = vector.extract_strided_slice %22 {offsets = [96, 128], sizes = [32, 64], strides = [1, 1]} : vector<160x192xf32> to vector<32x64xf32>
    %189 = arith.mulf %169, %188 : vector<32x64xf32>
    %c192 = arith.constant 192 : index
    %c0_70 = arith.constant 0 : index
    %190 = vector.load %arg16[%c192, %c0_70] : memref<320x64xbf16, #tpu.memory_space<vmem>>, vector<64x64xbf16>
    %191 = arith.truncf %189 : vector<32x64xf32> to vector<32x64xbf16>
    %cst_71 = arith.constant dense<0.000000e+00> : vector<32x64xf32>
    %192 = tpu.matmul %191, %190, %cst_71 {dimension_numbers = #tpu.dot_dimension_numbers<[1], [0], [0], [1], [0, 0, 1, 1], [], []>} : vector<32x64xbf16>, vector<64x64xbf16>, vector<32x64xf32> -> vector<32x64xf32>
    %193 = arith.addf %187, %192 : vector<32x64xf32>
    %194 = vector.extract_strided_slice %22 {offsets = [128, 128], sizes = [32, 64], strides = [1, 1]} : vector<160x192xf32> to vector<32x64xf32>
    %195 = arith.mulf %169, %194 : vector<32x64xf32>
    %c256 = arith.constant 256 : index
    %c0_72 = arith.constant 0 : index
    %196 = vector.load %arg16[%c256, %c0_72] : memref<320x64xbf16, #tpu.memory_space<vmem>>, vector<64x64xbf16>
    %197 = arith.truncf %195 : vector<32x64xf32> to vector<32x64xbf16>
    %cst_73 = arith.constant dense<0.000000e+00> : vector<32x64xf32>
    %198 = tpu.matmul %197, %196, %cst_73 {dimension_numbers = #tpu.dot_dimension_numbers<[1], [0], [0], [1], [0, 0, 1, 1], [], []>} : vector<32x64xbf16>, vector<64x64xbf16>, vector<32x64xf32> -> vector<32x64xf32>
    %199 = arith.addf %193, %198 : vector<32x64xf32>
    %200 = tpu.concatenate %199, %161 in 1 : vector<32x64xf32>, vector<32x64xf32> -> vector<32x128xf32>
    %c0_74 = arith.constant 0 : index
    %c0_75 = arith.constant 0 : index
    %201 = vector.load %arg17[%c0_74, %c0_75] : memref<32x128xf32, #tpu.memory_space<vmem>>, vector<32x128xf32>
    tpu.vector_store %arg17[%c0_74, %c0_75], %200 {strides = array<i32>} : memref<32x128xf32, #tpu.memory_space<vmem>>, vector<32x128xf32>,
    return
  }
  func.func @transform_0(%arg0: i32) -> (i32, i32) {
    %c0_i32 = arith.constant 0 : i32
    %c0_i32_0 = arith.constant 0 : i32
    return %arg0, %c0_i32 : i32, i32
  }
  func.func @transform_1(%arg0: i32) -> (i32, i32, i32) {
    %c0_i32 = arith.constant 0 : i32
    %c0_i32_0 = arith.constant 0 : i32
    %c0_i32_1 = arith.constant 0 : i32
    return %c0_i32, %arg0, %c0_i32_0 : i32, i32, i32
  }
  func.func @transform_2(%arg0: i32) -> (i32, i32, i32) {
    %c0_i32 = arith.constant 0 : i32
    %c0_i32_0 = arith.constant 0 : i32
    %c0_i32_1 = arith.constant 0 : i32
    return %c0_i32, %arg0, %c0_i32_0 : i32, i32, i32
  }
  func.func @transform_3(%arg0: i32) -> (i32, i32) {
    %c0_i32 = arith.constant 0 : i32
    %c0_i32_0 = arith.constant 0 : i32
    return %arg0, %c0_i32 : i32, i32
  }
  func.func @transform_4(%arg0: i32) -> (i32, i32) {
    %c0_i32 = arith.constant 0 : i32
    %c0_i32_0 = arith.constant 0 : i32
    %c0_i32_1 = arith.constant 0 : i32
    return %c0_i32, %c0_i32_0 : i32, i32
  }
  func.func @transform_5(%arg0: i32) -> (i32, i32) {
    %c0_i32 = arith.constant 0 : i32
    %c0_i32_0 = arith.constant 0 : i32
    %c0_i32_1 = arith.constant 0 : i32
    return %c0_i32, %c0_i32_0 : i32, i32
  }
  func.func @transform_6(%arg0: i32) -> (i32, i32) {
    %c0_i32 = arith.constant 0 : i32
    %c0_i32_0 = arith.constant 0 : i32
    %c0_i32_1 = arith.constant 0 : i32
    return %c0_i32, %c0_i32_0 : i32, i32
  }
  func.func @transform_7(%arg0: i32) -> (i32, i32) {
    %c0_i32 = arith.constant 0 : i32
    %c0_i32_0 = arith.constant 0 : i32
    %c0_i32_1 = arith.constant 0 : i32
    return %c0_i32, %c0_i32_0 : i32, i32
  }
  func.func @transform_8(%arg0: i32) -> (i32, i32) {
    %c0_i32 = arith.constant 0 : i32
    %c0_i32_0 = arith.constant 0 : i32
    %c0_i32_1 = arith.constant 0 : i32
    return %c0_i32, %c0_i32_0 : i32, i32
  }
  func.func @transform_9(%arg0: i32) -> (i32, i32) {
    %c0_i32 = arith.constant 0 : i32
    %c0_i32_0 = arith.constant 0 : i32
    %c0_i32_1 = arith.constant 0 : i32
    return %c0_i32, %c0_i32_0 : i32, i32
  }
  func.func @transform_10(%arg0: i32) -> (i32, i32) {
    %c0_i32 = arith.constant 0 : i32
    %c0_i32_0 = arith.constant 0 : i32
    %c0_i32_1 = arith.constant 0 : i32
    return %c0_i32, %c0_i32_0 : i32, i32
  }
  func.func @transform_11(%arg0: i32) -> (i32, i32) {
    %c0_i32 = arith.constant 0 : i32
    %c0_i32_0 = arith.constant 0 : i32
    %c0_i32_1 = arith.constant 0 : i32
    return %c0_i32, %c0_i32_0 : i32, i32
  }
  func.func @transform_12(%arg0: i32) -> (i32, i32) {
    %c0_i32 = arith.constant 0 : i32
    %c0_i32_0 = arith.constant 0 : i32
    %c0_i32_1 = arith.constant 0 : i32
    return %c0_i32, %c0_i32_0 : i32, i32
  }
  func.func @transform_13(%arg0: i32) -> (i32, i32) {
    %c0_i32 = arith.constant 0 : i32
    %c0_i32_0 = arith.constant 0 : i32
    %c0_i32_1 = arith.constant 0 : i32
    return %c0_i32, %c0_i32_0 : i32, i32
  }
  func.func @transform_14(%arg0: i32) -> (i32, i32) {
    %c0_i32 = arith.constant 0 : i32
    %c0_i32_0 = arith.constant 0 : i32
    %c0_i32_1 = arith.constant 0 : i32
    return %c0_i32, %c0_i32_0 : i32, i32
  }
  func.func @transform_15(%arg0: i32) -> (i32, i32) {
    %c0_i32 = arith.constant 0 : i32
    %c0_i32_0 = arith.constant 0 : i32
    %c0_i32_1 = arith.constant 0 : i32
    return %c0_i32, %c0_i32_0 : i32, i32
  }
  func.func @transform_16(%arg0: i32) -> (i32, i32) {
    %c0_i32 = arith.constant 0 : i32
    %c0_i32_0 = arith.constant 0 : i32
    return %arg0, %c0_i32 : i32, i32
  }
}

</mosaic_0001>

<bundles_post_ra>
// kernel: tpu_custom_call.1
= control target key start
LH: loop header
LB: loop body
LE: loop exit
PB: predicated region body
PF: predicated region fallthrough
CT: control target
= control target key end

     0   :  { %s3576_s0 = inlined_call_operand.vmem [shape: f32[32,10], index: 0, kind: input, shape index: {}]   ;;  %s3577_s1 = inlined_call_operand.vmem [shape: f32[3,32,12], index: 1, kind: input, shape index: {}]   ;;  %s3578_s2 = inlined_call_operand.vmem [shape: f32[5,32,14], index: 2, kind: input, shape index: {}]   ;;  %s3579_s3 = inlined_call_operand.vmem [shape: f32[32,64], index: 3, kind: input, shape index: {}]   ;;  %s3580_s4 = inlined_call_operand.vmem [shape: bf16[10,192], index: 4, kind: input, shape index: {}]   ;;  %s3581_s5 = inlined_call_operand.vmem [shape: f32[1,192], index: 5, kind: input, shape index: {}]   ;;  %s3582_s6 = inlined_call_operand.vmem [shape: bf16[12,128], index: 6, kind: input, shape index: {}]   ;;  %s3583_s7 = inlined_call_operand.vmem [shape: f32[1,128], index: 7, kind: input, shape index: {}]   ;;  %s3584_s8 = inlined_call_operand.vmem [shape: bf16[14,192], index: 8, kind: input, shape index: {}]   ;;  %s3585_s9 = inlined_call_operand.vmem [shape: f32[1,192], index: 9, kind: input, shape index: {}]   ;;  %s3586_s10 = inlined_call_operand.vmem [shape: bf16[64,128], index: 10, kind: input, shape index: {}]   ;;  %s3587_s11 = inlined_call_operand.vmem [shape: bf16[128,256], index: 11, kind: input, shape index: {}]   ;;  %s3588_s12 = inlined_call_operand.vmem [shape: f32[1,256], index: 12, kind: input, shape index: {}]   ;;  %s3589_s13 = inlined_call_operand.vmem [shape: bf16[64,128], index: 13, kind: input, shape index: {}]   ;;  %s3590_s14 = inlined_call_operand.vmem [shape: f32[1,128], index: 14, kind: input, shape index: {}]   ;;  %s3591_s15 = inlined_call_operand.vmem [shape: bf16[320,64], index: 15, kind: input, shape index: {}]   ;;  %s3592_s16 = inlined_call_operand.hbm [shape: f32[32,128], index: 16, kind: output, shape index: {}]  }
   0x1   :  { %3621 = sst [smem:[#allocation32_spill]] %s3576_s0 }
   0x2   :  { %v1842_v0 = vld [vmem:[%s3580_s4] sm:$0xf]  ;;  %v2101_v1 = vld [vmem:[%s3580_s4 + $0x4] sm:$0x10]  ;;  %vm84_vm0 = vcmask 1044480   ;;  %vm177_vm1 = vcmask 1045504  }
   0x3   :  { %v1843_v2 = vor.u32 %v2101_v1, %v1842_v0  ;;  %v2100_v3 = vld [vmem:[%s3580_s4 + $0x4] sm:$0xf]  ;;  %v1844_v4 = vld [vmem:[%s3580_s4 + $0x8] sm:$0x10]  ;;  %v1854_v5 = vld [vmem:[%s3582_s6] sm:$0xf] }
   0x4   :  { %v1847_v6 = vor.u32 %v2100_v3, %v1844_v4  ;;  %v2102_v7 = vld [vmem:[%s3582_s6] sm:$0x30]  ;;  %v1864_v8 = vld [vmem:[%s3584_s8] sm:$0xf]  ;;  %v2104_v9 = vld [vmem:[%s3584_s8 + $0x4] sm:$0x70] }
   0x5   :  { %v86_v10 = vsel %vm84_vm0, %v1843_v2, 0  ;;  %v1855_v11 = vor.u32 %v2102_v7, %v1854_v5  ;;  %v1865_v12 = vor.u32 %v2104_v9, %v1864_v8  ;;  %vm297_vm2 = vcmask 1046528   ;;  %s3622_s23 = sld [smem:[#allocation32_spill]]  ;;  %v129_v15 = vld [vmem:[%s3577_s1] sm:$0xff]  ;;  %v130_v18 = vld [vmem:[%s3577_s1 + $0x8] sm:$0xff] }
   0x6   :  { %98 = vmatpush.bf16.msra.mxu0 %v86_v10  ;;  %v89_v16 = vsel %vm84_vm0, %v1847_v6, 0  ;;  %vm77_vm3 = vcmask 80896   ;;  %v220_v19 = vld [vmem:[%s3578_s2] sm:$0xff]  ;;  %v221_v20 = vld [vmem:[%s3578_s2 + $0x8] sm:$0xff]  ;;  %v143_v23 = vpack.c.bf16 %v130_v18, %v129_v15  ;;  %vm158_vm4 = vcmask 97280  }
   0x7   :  { %117 = vmatpush.bf16.msra.mxu1 %v89_v16  ;;  %v179_v21 = vsel %vm177_vm1, %v1855_v11, 0  ;;  %v299_v22 = vsel %vm297_vm2, %v1865_v12, 0  ;;  %v2431_v24 = vpack.c.bf16 %v221_v20, %v220_v19  ;;  %vm266_vm5 = vcmask 113664  }
   0x8   :  { %188 = vmatpush.bf16.msra.mxu2 %v179_v21  ;;  %311 = vmatpush.bf16.msra.mxu3 %v299_v22 }
   0xb   :  { %v55_v13 = vld [vmem:[%s3622_s23] sm:$0xff]  ;;  %v56_v14 = vld [vmem:[%s3622_s23 + $0x8] sm:$0xff]  ;;  %1856 = vmatmul.msk.bf16.vlgmr.msra.gmra.mxu2 %vm158_vm4, %v143_v23  ;;  %1870 = vmatmul.msk.bf16.vlgmr.msra.gmra.mxu3 %vm266_vm5, %v2431_v24 }
   0xc   :  { %v61_v17 = vpack.c.bf16 %v56_v14, %v55_v13 }
   0xe   :  { %1848 = vmatmul.msk.bf16.vlgmr.msra.gmra.mxu0 %vm77_vm3, %v61_v17  ;;  %1850 = vmatmul.msk.bf16.vlgmr.msra.gmra.mxu1 %vm77_vm3, %v61_v17 }
   0xf   :  { %21 = vsyncpa [#allocation3], 0  ;;  %v57_v25 = vld [vmem:[%s3622_s23 + $0x10] sm:$0xff]  ;;  %v58_v26 = vld [vmem:[%s3622_s23 + $0x18] sm:$0xff]  ;;  %vm460_vm6 = vcmask 523264   ;;  %s2296_s22 = smov 64  }
  0x10   :  { %v131_v27 = vld [vmem:[%s3577_s1 + $0x10] sm:$0xff]  ;;  %v132_v28 = vld [vmem:[%s3577_s1 + $0x18] sm:$0xff]  ;;  %v62_v31 = vpack.c.bf16 %v58_v26, %v57_v25  ;;  %v133_v34 = vld [vmem:[%s3577_s1 + $0x20] sm:$0xff]  ;;  %s2298_s25 = smov 128  }
  0x11   :  { %v222_v29 = vld [vmem:[%s3578_s2 + $0x10] sm:$0xff]  ;;  %v223_v30 = vld [vmem:[%s3578_s2 + $0x18] sm:$0xff]  ;;  %v144_v32 = vpack.c.bf16 %v132_v28, %v131_v27  ;;  %v134_v35 = vld [vmem:[%s3577_s1 + $0x28] sm:$0xff] }
  0x12   :  { %v2456_v33 = vpack.c.bf16 %v223_v30, %v222_v29  ;;  %v224_v36 = vld [vmem:[%s3578_s2 + $0x20] sm:$0xff]  ;;  %v225_v37 = vld [vmem:[%s3578_s2 + $0x28] sm:$0xff]  ;;  %v145_v38 = vpack.c.bf16 %v134_v35, %v133_v34  ;;  %v135_v40 = vld [vmem:[%s3577_s1 + $0x30] sm:$0xff] }
  0x13   :  { %v2475_v39 = vpack.c.bf16 %v225_v37, %v224_v36  ;;  %v136_v41 = vld [vmem:[%s3577_s1 + $0x38] sm:$0xff]  ;;  %v226_v42 = vld [vmem:[%s3578_s2 + $0x30] sm:$0xff]  ;;  %v137_v46 = vld [vmem:[%s3577_s1 + $0x40] sm:$0xff] }
  0x14   :  { %v227_v43 = vld [vmem:[%s3578_s2 + $0x38] sm:$0xff]  ;;  %v146_v44 = vpack.c.bf16 %v136_v41, %v135_v40  ;;  %v138_v47 = vld [vmem:[%s3577_s1 + $0x48] sm:$0xff]  ;;  %v228_v48 = vld [vmem:[%s3578_s2 + $0x40] sm:$0xff] }
  0x15   :  { %v2492_v45 = vpack.c.bf16 %v227_v43, %v226_v42  ;;  %v229_v49 = vld [vmem:[%s3578_s2 + $0x48] sm:$0xff]  ;;  %v147_v50 = vpack.c.bf16 %v138_v47, %v137_v46  ;;  %v139_v52 = vld [vmem:[%s3577_s1 + $0x50] sm:$0xff]  ;;  %v140_v53 = vld [vmem:[%s3577_s1 + $0x58] sm:$0xff] }
  0x16   :  { %v2509_v51 = vpack.c.bf16 %v229_v49, %v228_v48  ;;  %v230_v54 = vld [vmem:[%s3578_s2 + $0x50] sm:$0xff]  ;;  %v231_v55 = vld [vmem:[%s3578_s2 + $0x58] sm:$0xff]  ;;  %v148_v56 = vpack.c.bf16 %v140_v53, %v139_v52  ;;  %v232_v59 = vld [vmem:[%s3578_s2 + $0x60] sm:$0xff] }
  0x17   :  { %v2526_v57 = vpack.c.bf16 %v231_v55, %v230_v54  ;;  %v2534_v58 = vld [vmem:[%s3586_s10 + $0x18] sm:$0xff]  ;;  %v233_v60 = vld [vmem:[%s3578_s2 + $0x68] sm:$0xff]  ;;  %v2550_v62 = vld [vmem:[%s3586_s10 + $0x10] sm:$0xff] }
  0x18   :  { %3623 = vst [vmem:[#allocation5_spill] sm:$0xff] %v2509_v51  ;;  %564 = vmatpush.bf16.msrb.mxu2 %v2534_v58  ;;  %719 = vmatpush.bf16.msrb.mxu3 %v2534_v58  ;;  %v2545_v61 = vpack.c.bf16 %v233_v60, %v232_v59  ;;  %v2560_v63 = vld [vmem:[%s3586_s10 + $0x8] sm:$0xff]  ;;  %v2567_v0 = vld [vmem:[%s3586_s10] sm:$0xff]  ;;  %v234_v1 = vld [vmem:[%s3578_s2 + $0x70] sm:$0xff] }
  0x19   :  { %3624 = vst [vmem:[#allocation6_spill] sm:$0xff] %v2526_v57  ;;  %471 = vmatpush.bf16.msrb.mxu1 %v2534_v58  ;;  %v235_v2 = vld [vmem:[%s3578_s2 + $0x78] sm:$0xff]  ;;  %v236_v4 = vld [vmem:[%s3578_s2 + $0x80] sm:$0xff]  ;;  %v237_v5 = vld [vmem:[%s3578_s2 + $0x88] sm:$0xff] }
  0x1a   :  { %3625 = vst [vmem:[#allocation7_spill] sm:$0xff] %v2545_v61  ;;  %v2581_v3 = vpack.c.bf16 %v235_v2, %v234_v1  ;;  %v63_v7 = vld [vmem:[%s3581_s5] sm:$0x3]  ;;  %v2600_v9 = vpack.c.bf16 %v237_v5, %v236_v4  ;;  %v238_v23 = vld [vmem:[%s3578_s2 + $0x90] sm:$0xff]  ;;  %v239_v25 = vld [vmem:[%s3578_s2 + $0x98] sm:$0xff] }
  0x1b   :  { %1857 = vmatmul.msk.bf16.gmra.mxu2 %vm158_vm4, %v144_v32  ;;  %1871 = vmatmul.msk.bf16.gmra.mxu3 %vm266_vm5, %v2456_v33  ;;  %v65_v10 = vperm.slane %v63_v7, 0  ;;  %v66_v11 = vperm.slane %v63_v7, 1  ;;  %v2627_v30 = vpack.c.bf16 %v239_v25, %v238_v23  ;;  %v2163_v47 = vld [vmem:[%s3583_s7] ss:$0 sm:$0xff] }
  0x1c   :  { %565 = vmatpush.bf16.msrb.mxu2 %v2550_v62  ;;  %720 = vmatpush.bf16.msrb.mxu3 %v2550_v62  ;;  %3626 = vst [vmem:[#allocation8_spill] sm:$0xff] %v2581_v3 }
  0x1d   :  { %472 = vmatpush.bf16.msrb.mxu1 %v2550_v62  ;;  %3627 = vst [vmem:[#allocation9_spill] sm:$0xff] %v2600_v9 }
  0x1e   :  { %1849 = vmatmul.msk.bf16.gmra.mxu0 %vm77_vm3, %v62_v31  ;;  %1851 = vmatmul.msk.bf16.gmra.mxu1 %vm77_vm3, %v62_v31  ;;  %3628 = vst [vmem:[#allocation10_spill] sm:$0xff] %v2627_v30 }
  0x20   :  { %566 = vmatpush.bf16.msrb.mxu2 %v2560_v63  ;;  %721 = vmatpush.bf16.msrb.mxu3 %v2560_v63 }
  0x21   :  { %473 = vmatpush.bf16.msrb.mxu1 %v2560_v63 }
  0x24   :  { %567 = vmatpush.bf16.msrb.mxu2 %v2567_v0  ;;  %722 = vmatpush.bf16.msrb.mxu3 %v2567_v0 }
  0x25   :  { %474 = vmatpush.bf16.msrb.mxu1 %v2567_v0 }
  0x28   :  { %626 = vmatpush.bf16.msra.mxu2 %v2534_v58 }
  0x29   :  { %502 = vmatpush.bf16.msra.mxu1 %v2534_v58 }
  0x2b   :  { %1858 = vmatmul.msk.bf16.gmra.mxu2 %vm158_vm4, %v145_v38  ;;  %1872 = vmatmul.msk.bf16.gmra.mxu3 %vm266_vm5, %v2475_v39 }
  0x2c   :  { %627 = vmatpush.bf16.msra.mxu2 %v2550_v62 }
  0x2d   :  { %503 = vmatpush.bf16.msra.mxu1 %v2550_v62 }
  0x30   :  { %628 = vmatpush.bf16.msra.mxu2 %v2560_v63 }
  0x31   :  { %504 = vmatpush.bf16.msra.mxu1 %v2560_v63 }
  0x34   :  { %629 = vmatpush.bf16.msra.mxu2 %v2567_v0 }
  0x35   :  { %505 = vmatpush.bf16.msra.mxu1 %v2567_v0 }
  0x3b   :  { %1859 = vmatmul.msk.bf16.gmra.mxu2 %vm158_vm4, %v146_v44  ;;  %1873 = vmatmul.msk.bf16.gmra.mxu3 %vm266_vm5, %v2492_v45 }
  0x4b   :  { %1860 = vmatmul.msk.bf16.gmra.mxu2 %vm158_vm4, %v147_v50  ;;  %1874 = vmatmul.msk.bf16.gmra.mxu3 %vm266_vm5, %v2509_v51 }
  0x5b   :  { %1861 = vmatmul.msk.bf16.gmra.mxu2 %vm158_vm4, %v148_v56  ;;  %1875 = vmatmul.msk.bf16.gmra.mxu3 %vm266_vm5, %v2526_v57 }
  0x6b   :  { %1876 = vmatmul.msk.bf16.gmra.mxu3 %vm266_vm5, %v2545_v61 }
  0x7b   :  { %1877 = vmatmul.msk.bf16.gmra.mxu3 %vm266_vm5, %v2581_v3 }
  0x8b   :  { %v100_v6 = vpop.f32.mrf.mxu0  ;;  %v119_v8 = vpop.f32.mrf.mxu1  ;;  %1878 = vmatmul.msk.bf16.gmra.mxu3 %vm266_vm5, %v2600_v9 }
  0x8c   :  { %v2604_v12 = vadd.f32 %v100_v6, %v65_v10  ;;  %v2606_v13 = vadd.f32 %v119_v8, %v66_v11 }
  0x8e   :  { %v190_v14 = vpop.f32.mrf.mxu2  ;;  %v2608_v15 = vpop.f32.mrf.mxu3  ;;  %v422_v20 = vmul.f32 %v2606_v13, %v2604_v12 }
  0x8f   :  { %v2657_v49 = vadd.f32 %v2163_v47, %v190_v14 }
  0x91   :  { %v486_v54 = vmul.f32 %v2657_v49, %v2606_v13 }
  0x93   :  { %v102_v16 = vpop.f32.mrf.mxu0  ;;  %v121_v17 = vpop.f32.mrf.mxu1 }
  0x94   :  { %v2610_v18 = vadd.f32 %v102_v16, %v65_v10  ;;  %v2612_v19 = vadd.f32 %v121_v17, %v66_v11 }
  0x96   :  { %v423_v21 = vmul.f32 %v2612_v19, %v2610_v18  ;;  %v192_v26 = vpop.f32.mrf.mxu2  ;;  %v2624_v27 = vpop.f32.mrf.mxu3 }
  0x97   :  { %v2655_v48 = vadd.f32 %v2163_v47, %v192_v26 }
  0x98   :  { %v434_v22 = vpack.c.bf16 %v423_v21, %v422_v20 }
  0x99   :  { %v487_v53 = vmul.f32 %v2655_v48, %v2612_v19 }
  0x9a   :  { %1906 = vmatmul.msk.bf16.vlgmr.msrb.gmra.mxu1 %vm460_vm6, %v434_v22 }
  0x9b   :  { %v105_v28 = vpop.f32.mrf.mxu0  ;;  %v124_v29 = vpop.f32.mrf.mxu1  ;;  %533 = vmatpush.bf16.msrb.mxu1 %v2534_v58  ;;  %1879 = vmatmul.msk.bf16.gmra.mxu3 %vm266_vm5, %v2627_v30  ;;  %v490_v55 = vpack.c.bf16 %v487_v53, %v486_v54 }
  0x9c   :  { %v2633_v31 = vadd.f32 %v105_v28, %v65_v10  ;;  %v2635_v32 = vadd.f32 %v124_v29, %v66_v11 }
  0x9e   :  { %3629 = vst [vmem:[#allocation11_spill] sm:$0xff] %v2633_v31  ;;  %v195_v34 = vpop.f32.mrf.mxu2  ;;  %v2637_v35 = vpop.f32.mrf.mxu3  ;;  %v424_v41 = vmul.f32 %v2635_v32, %v2633_v31 }
  0x9f   :  { %534 = vmatpush.bf16.msrb.mxu1 %v2550_v62  ;;  %v2672_v1 = vadd.f32 %v2163_v47, %v195_v34 }
  0xa1   :  { %3632 = vst [vmem:[#allocation14_spill] sm:$0xff] %v2672_v1  ;;  %v488_v6 = vmul.f32 %v2672_v1, %v2635_v32 }
  0xa3   :  { %v107_v36 = vpop.f32.mrf.mxu0  ;;  %v126_v37 = vpop.f32.mrf.mxu1  ;;  %535 = vmatpush.bf16.msrb.mxu1 %v2560_v63 }
  0xa4   :  { %v2640_v38 = vadd.f32 %v107_v36, %v65_v10  ;;  %v2642_v40 = vadd.f32 %v126_v37, %v66_v11 }
  0xa6   :  { %3630 = vst [vmem:[#allocation12_spill] sm:$0xff] %v2640_v38  ;;  %v425_v42 = vmul.f32 %v2642_v40, %v2640_v38  ;;  %v197_v44 = vpop.f32.mrf.mxu2  ;;  %v2649_v46 = vpop.f32.mrf.mxu3 }
  0xa7   :  { %536 = vmatpush.bf16.msrb.mxu1 %v2567_v0  ;;  %v2670_v60 = vadd.f32 %v2163_v47, %v197_v44 }
  0xa8   :  { %v435_v43 = vpack.c.bf16 %v425_v42, %v424_v41 }
  0xa9   :  { %3631 = vst [vmem:[#allocation13_spill] sm:$0xff] %v2670_v60  ;;  %v489_v5 = vmul.f32 %v2670_v60, %v2642_v40 }
  0xaa   :  { %1907 = vmatmul.msk.bf16.gmra.mxu1 %vm460_vm6, %v435_v43 }
  0xab   :  { %v491_v7 = vpack.c.bf16 %v489_v5, %v488_v6 }
  0xae   :  { %v200_v50 = vpop.f32.mrf.mxu2  ;;  %v2659_v52 = vpop.f32.mrf.mxu3 }
  0xaf   :  { %v2687_v14 = vadd.f32 %v2163_v47, %v200_v50 }
  0xb1   :  { %v517_v21 = vmul.f32 %v2687_v14, %v2606_v13 }
  0xb6   :  { %v202_v56 = vpop.f32.mrf.mxu2  ;;  %v2665_v59 = vpop.f32.mrf.mxu3 }
  0xb7   :  { %v2685_v11 = vadd.f32 %v2163_v47, %v202_v56 }
  0xb9   :  { %v518_v20 = vmul.f32 %v2685_v11, %v2612_v19 }
  0xba   :  { %1908 = vmatmul.msk.bf16.vlgmr.msra.gmra.mxu1 %vm460_vm6, %v490_v55 }
  0xbb   :  { %595 = vmatpush.bf16.msra.mxu1 %v2534_v58  ;;  %v521_v22 = vpack.c.bf16 %v518_v20, %v517_v21 }
  0xbe   :  { %v205_v2 = vpop.f32.mrf.mxu2  ;;  %v2674_v4 = vpop.f32.mrf.mxu3 }
  0xbf   :  { %596 = vmatpush.bf16.msra.mxu1 %v2550_v62  ;;  %v2709_v41 = vadd.f32 %v2163_v47, %v205_v2 }
  0xc1   :  { %3634 = vst [vmem:[#allocation16_spill] sm:$0xff] %v2709_v41  ;;  %v519_v50 = vmul.f32 %v2709_v41, %v2635_v32 }
  0xc3   :  { %597 = vmatpush.bf16.msra.mxu1 %v2560_v63 }
  0xc6   :  { %v207_v8 = vpop.f32.mrf.mxu2  ;;  %v2682_v10 = vpop.f32.mrf.mxu3 }
  0xc7   :  { %598 = vmatpush.bf16.msra.mxu1 %v2567_v0  ;;  %v2706_v37 = vadd.f32 %v2163_v47, %v207_v8 }
  0xc9   :  { %3633 = vst [vmem:[#allocation15_spill] sm:$0xff] %v2706_v37  ;;  %v520_v44 = vmul.f32 %v2706_v37, %v2642_v40 }
  0xca   :  { %1909 = vmatmul.msk.bf16.gmra.mxu1 %vm460_vm6, %v491_v7 }
  0xcb   :  { %v522_v53 = vpack.c.bf16 %v520_v44, %v519_v50 }
  0xce   :  { %v210_v16 = vpop.f32.mrf.mxu2  ;;  %v2689_v17 = vpop.f32.mrf.mxu3 }
  0xcf   :  { %v2695_v23 = vadd.f32 %v2163_v47, %v210_v16 }
  0xd1   :  { %v548_v29 = vmul.f32 %v2695_v23, %v2606_v13 }
  0xd6   :  { %v212_v25 = vpop.f32.mrf.mxu2  ;;  %v335_v26 = vpop.f32.mrf.mxu3 }
  0xd7   :  { %v2698_v28 = vadd.f32 %v2163_v47, %v212_v25 }
  0xd9   :  { %v549_v34 = vmul.f32 %v2698_v28, %v2612_v19 }
  0xda   :  { %1910 = vmatmul.msk.bf16.vlgmr.msrb.gmra.mxu1 %vm460_vm6, %v521_v22 }
  0xdb   :  { %657 = vmatpush.bf16.msrb.mxu1 %v2534_v58  ;;  %v552_v36 = vpack.c.bf16 %v549_v34, %v548_v29 }
  0xdd   :  { %1912 = vmatmul.msk.bf16.vlgmr.msrb.gmra.mxu2 %vm460_vm6, %v552_v36 }
  0xde   :  { %v215_v42 = vpop.f32.mrf.mxu2  ;;  %v2711_v43 = vpop.f32.mrf.mxu3  ;;  %688 = vmatpush.bf16.msrb.mxu2 %v2534_v58  ;;  %v252_v58 = vld [vmem:[%s3585_s9] sm:$0x3] }
  0xdf   :  { %658 = vmatpush.bf16.msrb.mxu1 %v2550_v62  ;;  %v2721_v54 = vadd.f32 %v2163_v47, %v215_v42  ;;  %v2734_v6 = vperm.slane %v252_v58, 0 }
  0xe1   :  { %3635 = vst [vmem:[#allocation17_spill] sm:$0xff] %v2721_v54  ;;  %v2765_v34 = vadd.f32 %v2649_v46, %v2734_v6  ;;  %v2778_v44 = vadd.f32 %v2682_v10, %v2734_v6  ;;  %v2782_v46 = vadd.f32 %v2674_v4, %v2734_v6  ;;  %v2795_v10 = vadd.f32 %v2689_v17, %v2734_v6 }
  0xe2   :  { %689 = vmatpush.bf16.msrb.mxu2 %v2550_v62  ;;  %v550_v62 = vmul.f32 %v2721_v54, %v2635_v32 }
  0xe3   :  { %659 = vmatpush.bf16.msrb.mxu1 %v2560_v63  ;;  %3637 = vst [vmem:[#allocation19_spill] sm:$0xff] %v2765_v34  ;;  %v582_v36 = vmul.f32 %v2765_v34, %v2642_v40 }
  0xe4   :  { %3639 = vst [vmem:[#allocation21_spill] sm:$0xff] %v2778_v44 }
  0xe5   :  { %3640 = vst [vmem:[#allocation22_spill] sm:$0xff] %v2782_v46 }
  0xe6   :  { %v217_v55 = vpop.f32.mrf.mxu2  ;;  %v340_v56 = vpop.f32.mrf.mxu3  ;;  %690 = vmatpush.bf16.msrb.mxu2 %v2560_v63  ;;  %v2739_v63 = vadd.f32 %v2624_v27, %v2734_v6  ;;  %v2756_v27 = vadd.f32 %v2659_v52, %v2734_v6  ;;  %v2770_v52 = vadd.f32 %v2637_v35, %v2734_v6  ;;  %v613_v35 = vmul.f32 %v2778_v44, %v2642_v40 }
  0xe7   :  { %660 = vmatpush.bf16.msrb.mxu1 %v2567_v0  ;;  %v2728_v2 = vadd.f32 %v2163_v47, %v217_v55  ;;  %v2744_v47 = vadd.f32 %v2608_v15, %v2734_v6  ;;  %v612_v55 = vmul.f32 %v2782_v46, %v2635_v32 }
  0xe8   :  { %v580_v16 = vmul.f32 %v2739_v63, %v2612_v19  ;;  %v610_v25 = vmul.f32 %v2756_v27, %v2606_v13  ;;  %3638 = vst [vmem:[#allocation20_spill] sm:$0xff] %v2770_v52  ;;  %v581_v42 = vmul.f32 %v2770_v52, %v2635_v32 }
  0xe9   :  { %3636 = vst [vmem:[#allocation18_spill] sm:$0xff] %v2728_v2  ;;  %v551_v5 = vmul.f32 %v2728_v2, %v2642_v40  ;;  %v579_v20 = vmul.f32 %v2744_v47, %v2606_v13  ;;  %v615_v58 = vpack.c.bf16 %v613_v35, %v612_v55  ;;  %v2827_v55 = vadd.f32 %v340_v56, %v2734_v6 }
  0xea   :  { %1911 = vmatmul.msk.bf16.gmra.mxu1 %vm460_vm6, %v522_v53  ;;  %691 = vmatpush.bf16.msrb.mxu2 %v2567_v0  ;;  %v2752_v0 = vadd.f32 %v2665_v59, %v2734_v6  ;;  %v584_v50 = vpack.c.bf16 %v582_v36, %v581_v42 }
  0xeb   :  { %v553_v7 = vpack.c.bf16 %v551_v5, %v550_v62  ;;  %v583_v21 = vpack.c.bf16 %v580_v16, %v579_v20  ;;  %v2790_v62 = vadd.f32 %v335_v26, %v2734_v6  ;;  %3644 = vst [vmem:[#allocation26_spill] sm:$0xff] %v2827_v55 }
  0xec   :  { %v611_v15 = vmul.f32 %v2752_v0, %v2612_v19 }
  0xed   :  { %1913 = vmatmul.msk.bf16.gmra.mxu2 %vm460_vm6, %v553_v7  ;;  %v642_v5 = vmul.f32 %v2790_v62, %v2612_v19  ;;  %v641_v7 = vmul.f32 %v2795_v10, %v2606_v13 }
  0xee   :  { %v343_v8 = vpop.f32.mrf.mxu3  ;;  %v614_v29 = vpack.c.bf16 %v611_v15, %v610_v25 }
  0xef   :  { %v645_v26 = vpack.c.bf16 %v642_v5, %v641_v7 }
  0xf6   :  { %v345_v22 = vpop.f32.mrf.mxu3 }
  0xf7   :  { %v2802_v16 = vadd.f32 %v345_v22, %v2734_v6 }
  0xf9   :  { %3641 = vst [vmem:[#allocation23_spill] sm:$0xff] %v2802_v16  ;;  %v673_v25 = vmul.f32 %v2802_v16, %v2612_v19 }
  0xfa   :  { %1914 = vmatmul.msk.bf16.vlgmr.msra.gmra.mxu1 %vm460_vm6, %v583_v21  ;;  %v2807_v21 = vadd.f32 %v343_v8, %v2734_v6 }
  0xfc   :  { %v672_v22 = vmul.f32 %v2807_v21, %v2606_v13 }
  0xfd   :  { %1916 = vmatmul.msk.bf16.vlgmr.msra.gmra.mxu2 %vm460_vm6, %v614_v29 }
  0xfe   :  { %v348_v59 = vpop.f32.mrf.mxu3  ;;  %v676_v42 = vpack.c.bf16 %v673_v25, %v672_v22 }
 0x106   :  { %v350_v53 = vpop.f32.mrf.mxu3 }
 0x107   :  { %v2840_v5 = vadd.f32 %v350_v53, %v2734_v6 }
 0x109   :  { %3646 = vst [vmem:[#allocation28_spill] sm:$0xff] %v2840_v5  ;;  %v675_v25 = vmul.f32 %v2840_v5, %v2642_v40 }
 0x10a   :  { %1915 = vmatmul.msk.bf16.gmra.mxu1 %vm460_vm6, %v584_v50 }
 0x10d   :  { %1917 = vmatmul.msk.bf16.gmra.mxu2 %vm460_vm6, %v615_v58  ;;  %v2833_v58 = vadd.f32 %v2711_v43, %v2734_v6 }
 0x10e   :  { %v353_v4 = vpop.f32.mrf.mxu3 }
 0x10f   :  { %v2810_v15 = vadd.f32 %v353_v4, %v2734_v6  ;;  %3645 = vst [vmem:[#allocation27_spill] sm:$0xff] %v2833_v58 }
 0x111   :  { %3642 = vst [vmem:[#allocation24_spill] sm:$0xff] %v2810_v15  ;;  %v703_v36 = vmul.f32 %v2810_v15, %v2606_v13  ;;  %v644_v13 = vmul.f32 %v2827_v55, %v2642_v40 }
 0x116   :  { %v355_v17 = vpop.f32.mrf.mxu3 }
 0x117   :  { %v2804_v20 = vpop.f32.mrf.mxu1  ;;  %v2816_v29 = vadd.f32 %v355_v17, %v2734_v6 }
 0x119   :  { %3643 = vst [vmem:[#allocation25_spill] sm:$0xff] %v2816_v29  ;;  %v704_v8 = vmul.f32 %v2816_v29, %v2612_v19  ;;  %v643_v19 = vmul.f32 %v2833_v58, %v2635_v32 }
 0x11a   :  { %1918 = vmatmul.msk.bf16.vlgmr.msrb.gmra.mxu1 %vm460_vm6, %v645_v26  ;;  %v2845_v26 = vadd.f32 %v348_v59, %v2734_v6 }
 0x11b   :  { %v707_v50 = vpack.c.bf16 %v704_v8, %v703_v36  ;;  %v646_v7 = vpack.c.bf16 %v644_v13, %v643_v19 }
 0x11c   :  { %3647 = vst [vmem:[#allocation29_spill] sm:$0xff] %v2845_v26  ;;  %v674_v53 = vmul.f32 %v2845_v26, %v2635_v32 }
 0x11d   :  { %1920 = vmatmul.msk.bf16.vlgmr.msrb.gmra.mxu2 %vm460_vm6, %v676_v42  ;;  %1922 = vmatmul.msk.bf16.vlgmr.msrb.gmra.mxu3 %vm460_vm6, %v707_v50 }
 0x11e   :  { %v358_v4 = vpop.f32.mrf.mxu3  ;;  %v677_v42 = vpack.c.bf16 %v675_v25, %v674_v53 }
 0x11f   :  { %v2824_v35 = vpop.f32.mrf.mxu1  ;;  %v2848_v17 = vadd.f32 %v358_v4, %v2734_v6 }
 0x121   :  { %3648 = vst [vmem:[#allocation30_spill] sm:$0xff] %v2848_v17  ;;  %v705_v36 = vmul.f32 %v2848_v17, %v2635_v32  ;;  %v1866_v17 = vld [vmem:[%s3584_s8 + $0x8] sm:$0x70] }
 0x126   :  { %v360_v43 = vpop.f32.mrf.mxu3 }
 0x127   :  { %v2842_v56 = vpop.f32.mrf.mxu1  ;;  %v2854_v22 = vadd.f32 %v360_v43, %v2734_v6 }
 0x129   :  { %3649 = vst [vmem:[#allocation31_spill] sm:$0xff] %v2854_v22  ;;  %v706_v59 = vmul.f32 %v2854_v22, %v2642_v40  ;;  %v2103_v22 = vld [vmem:[%s3584_s8 + $0x4] sm:$0xf] }
 0x12a   :  { %1919 = vmatmul.msk.bf16.gmra.mxu1 %vm460_vm6, %v646_v7  ;;  %v1869_v5 = vor.u32 %v2103_v22, %v1866_v17 }
 0x12b   :  { %v708_v50 = vpack.c.bf16 %v706_v59, %v705_v36 }
 0x12c   :  { %v302_v58 = vsel %vm297_vm2, %v1869_v5, 0 }
 0x12d   :  { %1921 = vmatmul.msk.bf16.gmra.mxu2 %vm460_vm6, %v677_v42  ;;  %1923 = vmatmul.msk.bf16.gmra.mxu3 %vm460_vm6, %v708_v50 }
 0x12e   :  { %370 = vmatpush.bf16.msrb.mxu0 %v302_v58 }
 0x12f   :  { %v2862_v8 = vpop.f32.mrf.mxu1 }
 0x131   :  { %1880 = vmatmul.msk.bf16.vlgmr.msrb.gmra.mxu0 %vm266_vm5, %v2431_v24 }
 0x137   :  { %v507_v4 = vpop.f32.mrf.mxu1 }
 0x138   :  { %v734_v26 = vmax.f32 %v2804_v20, %v507_v4 }
 0x13f   :  { %v2866_v6 = vpop.f32.mrf.mxu1 }
 0x140   :  { %v735_v2 = vmax.f32 %v2824_v35, %v2866_v6 }
 0x141   :  { %1881 = vmatmul.msk.bf16.gmra.mxu0 %vm266_vm5, %v2456_v33 }
 0x147   :  { %v2868_v13 = vpop.f32.mrf.mxu1 }
 0x148   :  { %v736_v58 = vmax.f32 %v2842_v56, %v2868_v13 }
 0x14f   :  { %v2870_v19 = vpop.f32.mrf.mxu1 }
 0x151   :  { %1882 = vmatmul.msk.bf16.gmra.mxu0 %vm266_vm5, %v2475_v39 }
 0x157   :  { %v538_v7 = vpop.f32.mrf.mxu1 }
 0x158   :  { %v738_v44 = vmax.f32 %v734_v26, %v538_v7 }
 0x15f   :  { %v2872_v32 = vpop.f32.mrf.mxu1 }
 0x160   :  { %v569_v43 = vpop.f32.mrf.mxu2  ;;  %v739_v22 = vmax.f32 %v735_v2, %v2872_v32 }
 0x161   :  { %v742_v51 = vmax.f32 %v738_v44, %v569_v43  ;;  %1883 = vmatmul.msk.bf16.gmra.mxu0 %vm266_vm5, %v2492_v45 }
 0x167   :  { %v2874_v40 = vpop.f32.mrf.mxu1 }
 0x168   :  { %v2876_v30 = vpop.f32.mrf.mxu2  ;;  %v740_v24 = vmax.f32 %v736_v58, %v2874_v40 }
 0x169   :  { %v743_v44 = vmax.f32 %v739_v22, %v2876_v30 }
 0x16f   :  { %v2878_v25 = vpop.f32.mrf.mxu1 }
 0x170   :  { %v2880_v53 = vpop.f32.mrf.mxu2 }
 0x171   :  { %v744_v2 = vmax.f32 %v740_v24, %v2880_v53 }
 0x177   :  { %v600_v36 = vpop.f32.mrf.mxu1 }
 0x178   :  { %v2882_v59 = vpop.f32.mrf.mxu2  ;;  %v746_v34 = vmax.f32 %v742_v51, %v600_v36 }
 0x17f   :  { %v2884_v42 = vpop.f32.mrf.mxu1 }
 0x180   :  { %v631_v50 = vpop.f32.mrf.mxu2  ;;  %v747_v51 = vmax.f32 %v743_v44, %v2884_v42 }
 0x181   :  { %v750_v52 = vmax.f32 %v746_v34, %v631_v50 }
 0x187   :  { %v2886_v9 = vpop.f32.mrf.mxu1 }
 0x188   :  { %v2888_v3 = vpop.f32.mrf.mxu2 }
 0x189   :  { %v751_v60 = vmax.f32 %v747_v51, %v2888_v3 }
 0x18f   :  { %v2890_v61 = vpop.f32.mrf.mxu1 }
 0x190   :  { %v2892_v57 = vpop.f32.mrf.mxu2 }
 0x197   :  { %v662_v55 = vpop.f32.mrf.mxu1 }
 0x198   :  { %v2902_v46 = vpop.f32.mrf.mxu2  ;;  %v754_v54 = vmax.f32 %v750_v52, %v662_v55 }
 0x19f   :  { %v2908_v17 = vpop.f32.mrf.mxu1 }
 0x1a0   :  { %v693_v37 = vpop.f32.mrf.mxu2  ;;  %v724_v5 = vpop.f32.mrf.mxu3  ;;  %v755_v58 = vmax.f32 %v751_v60, %v2908_v17 }
 0x1a1   :  { %v758_v26 = vmax.f32 %v754_v54, %v693_v37 }
 0x1a3   :  { %v762_v41 = vmax.f32 %v758_v26, %v724_v5  ;;  %v737_v26 = vmax.f32 %v2862_v8, %v2870_v19 }
 0x1a5   :  { %v766_v34 = vsub.f32 %v2804_v20, %v762_v41  ;;  %v782_v52 = vsub.f32 %v507_v4, %v762_v41  ;;  %v806_v29 = vsub.f32 %v538_v7, %v762_v41  ;;  %v830_v15 = vsub.f32 %v569_v43, %v762_v41 }
 0x1a6   :  { %v854_v54 = vsub.f32 %v600_v36, %v762_v41  ;;  %v878_v1 = vsub.f32 %v631_v50, %v762_v41  ;;  %v902_v22 = vsub.f32 %v662_v55, %v762_v41  ;;  %v926_v20 = vsub.f32 %v693_v37, %v762_v41 }
 0x1a7   :  { %v770_v38 = vmul.f32 1.442695, %v766_v34  ;;  %v786_v16 = vmul.f32 1.442695, %v782_v52  ;;  %v810_v31 = vmul.f32 1.442695, %v806_v29  ;;  %v748_v7 = vmax.f32 %v744_v2, %v2886_v9  ;;  %v2923_v50 = vpop.f32.mrf.mxu1 }
 0x1a8   :  { %v834_v44 = vmul.f32 1.442695, %v830_v15  ;;  %v695_v4 = vpop.f32.mrf.mxu2  ;;  %v858_v43 = vmul.f32 1.442695, %v854_v54  ;;  %v950_v24 = vsub.f32 %v724_v5, %v762_v41  ;;  %v882_v36 = vmul.f32 1.442695, %v878_v1  ;;  %v726_v29 = vpop.f32.mrf.mxu3 }
 0x1a9   :  { %2165 = vpow2.f32 %v770_v38  ;;  %v759_v51 = vmax.f32 %v755_v58, %v695_v4  ;;  %v741_v55 = vmax.f32 %v737_v26, %v2878_v25  ;;  %v752_v60 = vmax.f32 %v748_v7, %v2892_v57 }
 0x1aa   :  { %2167 = vpow2.f32 %v786_v16  ;;  %v906_v37 = vmul.f32 1.442695, %v902_v22  ;;  %v930_v15 = vmul.f32 1.442695, %v926_v20  ;;  %v954_v1 = vmul.f32 1.442695, %v950_v24 }
 0x1ab   :  { %2169 = vpow2.f32 %v810_v31  ;;  %v763_v38 = vmax.f32 %v759_v51, %v726_v29  ;;  %v745_v41 = vmax.f32 %v741_v55, %v2882_v59  ;;  %v756_v16 = vmax.f32 %v752_v60, %v2923_v50 }
 0x1ac   :  { %2171 = vpow2.f32 %v834_v44 }
 0x1ad   :  { %2173 = vpow2.f32 %v858_v43  ;;  %v767_v5 = vsub.f32 %v2824_v35, %v763_v38  ;;  %v783_v33 = vsub.f32 %v2866_v6, %v763_v38  ;;  %v807_v34 = vsub.f32 %v2872_v32, %v763_v38 }
 0x1ae   :  { %2175 = vpow2.f32 %v882_v36  ;;  %v831_v31 = vsub.f32 %v2876_v30, %v763_v38  ;;  %v855_v2 = vsub.f32 %v2884_v42, %v763_v38  ;;  %v879_v54 = vsub.f32 %v2888_v3, %v763_v38 }
 0x1af   :  { %v2934_v52 = vpop.eup %2165  ;;  %2177 = vpow2.f32 %v906_v37  ;;  %v772_v26 = vmul.f32 1.442695, %v767_v5  ;;  %v788_v58 = vmul.f32 1.442695, %v783_v33  ;;  %v812_v44 = vmul.f32 1.442695, %v807_v34 }
 0x1b0   :  { %v2939_v22 = vpop.eup %2167  ;;  %2179 = vpow2.f32 %v930_v15  ;;  %v2941_v35 = vpop.f32.mrf.mxu2  ;;  %v836_v20 = vmul.f32 1.442695, %v831_v31  ;;  %v860_v30 = vmul.f32 1.442695, %v855_v2  ;;  %v884_v3 = vmul.f32 1.442695, %v879_v54 }
 0x1b1   :  { %v2943_v6 = vpop.eup %2169  ;;  %v794_v32 = vadd.f32 %v2939_v22, %v2934_v52  ;;  %2181 = vpow2.f32 %v954_v1  ;;  %v903_v42 = vsub.f32 %v2908_v17, %v763_v38  ;;  %v927_v43 = vsub.f32 %v695_v4, %v763_v38  ;;  %v2957_v1 = vpop.f32.mrf.mxu3 }
 0x1b2   :  { %v2947_v7 = vpop.eup %2171  ;;  %2183 = vpow2.f32 %v772_v26  ;;  %v951_v51 = vsub.f32 %v726_v29, %v763_v38  ;;  %v760_v55 = vmax.f32 %v756_v16, %v2941_v35  ;;  %v749_v37 = vmax.f32 %v745_v41, %v2890_v61  ;;  %v2971_v31 = vpop.f32.mrf.mxu1 }
 0x1b3   :  { %v2950_v24 = vpop.eup %2173  ;;  %v818_v36 = vadd.f32 %v2943_v6, %v794_v32  ;;  %2185 = vpow2.f32 %v788_v58  ;;  %v908_v15 = vmul.f32 1.442695, %v903_v42  ;;  %v932_v4 = vmul.f32 1.442695, %v927_v43 }
 0x1b4   :  { %v2954_v60 = vpop.eup %2175  ;;  %2187 = vpow2.f32 %v812_v44  ;;  %v2963_v33 = vmax.f32 %v760_v55, %v2957_v1  ;;  %v753_v38 = vmax.f32 %v749_v37, %v2902_v46  ;;  %v956_v16 = vmul.f32 1.442695, %v951_v51 }
 0x1b5   :  { %v2959_v5 = vpop.eup %2177  ;;  %v842_v17 = vadd.f32 %v2947_v7, %v818_v36  ;;  %2189 = vpow2.f32 %v836_v20  ;;  %v870_v45 = vmul.f32 %v2950_v24, %v2744_v47 }
 0x1b6   :  { %v2965_v29 = vpop.eup %2179  ;;  %2191 = vpow2.f32 %v860_v30  ;;  %v768_v2 = vsub.f32 %v2842_v56, %v2963_v33  ;;  %v784_v54 = vsub.f32 %v2868_v13, %v2963_v33  ;;  %v808_v58 = vsub.f32 %v2874_v40, %v2963_v33 }
 0x1b7   :  { %v2968_v41 = vpop.eup %2181  ;;  %v866_v34 = vadd.f32 %v2950_v24, %v842_v17  ;;  %2193 = vpow2.f32 %v884_v3  ;;  %v832_v44 = vsub.f32 %v2880_v53, %v2963_v33  ;;  %v856_v32 = vsub.f32 %v2886_v9, %v2963_v33 }
 0x1b8   :  { %v2184_v26 = vpop.eup %2183  ;;  %2195 = vpow2.f32 %v908_v15  ;;  %v774_v3 = vmul.f32 1.442695, %v768_v2  ;;  %v790_v56 = vmul.f32 1.442695, %v784_v54  ;;  %v757_v43 = vmax.f32 %v753_v38, %v2971_v31 }
 0x1b9   :  { %v2186_v20 = vpop.eup %2185  ;;  %v890_v30 = vadd.f32 %v2954_v60, %v866_v34  ;;  %2197 = vpow2.f32 %v932_v4  ;;  %v814_v36 = vmul.f32 1.442695, %v808_v58  ;;  %v838_v53 = vmul.f32 1.442695, %v832_v44  ;;  %v2999_v4 = vpop.f32.mrf.mxu2 }
 0x1ba   :  { %v2984_v42 = vpop.eup %2187  ;;  %v795_v13 = vadd.f32 %v2186_v20, %v2184_v26  ;;  %2199 = vpow2.f32 %v956_v16  ;;  %v880_v51 = vsub.f32 %v2892_v57, %v2963_v33  ;;  %v862_v15 = vmul.f32 1.442695, %v856_v32 }
 0x1bb   :  { %v2989_v40 = vpop.eup %2189  ;;  %v914_v9 = vadd.f32 %v2959_v5, %v890_v30  ;;  %2201 = vpow2.f32 %v774_v3  ;;  %v904_v17 = vsub.f32 %v2923_v50, %v2963_v33  ;;  %v928_v34 = vsub.f32 %v2941_v35, %v2963_v33 }
 0x1bc   :  { %v2994_v55 = vpop.eup %2191  ;;  %v819_v37 = vadd.f32 %v2984_v42, %v795_v13  ;;  %2203 = vpow2.f32 %v790_v56  ;;  %v886_v16 = vmul.f32 1.442695, %v880_v51  ;;  %v952_v57 = vsub.f32 %v2957_v1, %v2963_v33  ;;  %v983_v33 = vld [vmem:[%s3579_s3 + $0x8] sm:$0xff] }
 0x1bd   :  { %v3001_v39 = vpop.eup %2193  ;;  %v938_v38 = vadd.f32 %v2965_v29, %v914_v9  ;;  %2205 = vpow2.f32 %v814_v36  ;;  %v778_v50 = vmul.f32 %v2934_v52, %v2604_v12  ;;  %v798_v58 = vmul.f32 %v2939_v22, %v2657_v49  ;;  %v3027_v52 = vpop.f32.mrf.mxu3  ;;  %1008 = vrot.lane.b32.xlu1 %v983_v33, %s2296_s22 }
 0x1be   :  { %v3008_v2 = vpop.eup %2195  ;;  %v843_v54 = vadd.f32 %v2989_v40, %v819_v37  ;;  %2207 = vpow2.f32 %v838_v53  ;;  %v761_v35 = vmax.f32 %v757_v43, %v2999_v4  ;;  %v822_v1 = vmul.f32 %v2943_v6, %v2687_v14 }
 0x1bf   :  { %v3015_v44 = vpop.eup %2197  ;;  %v962_v32 = vadd.f32 %v2968_v41, %v938_v38  ;;  %2209 = vpow2.f32 %v862_v15  ;;  %v910_v49 = vmul.f32 1.442695, %v904_v17  ;;  %v846_v22 = vmul.f32 %v2947_v7, %v2695_v23 }
 0x1c0   :  { %v3024_v30 = vpop.eup %2199  ;;  %v867_v12 = vadd.f32 %v2994_v55, %v843_v54  ;;  %2211 = vpow2.f32 %v886_v16  ;;  %v934_v14 = vmul.f32 1.442695, %v928_v34  ;;  %v958_v6 = vmul.f32 1.442695, %v952_v57 }
 0x1c1   :  { %v3032_v3 = vpop.eup %2201  ;;  %v3035_v56 = vmax.f32 %v761_v35, %v3027_v52  ;;  %2213 = vrcp.f32 %v962_v32  ;;  %v779_v36 = vmul.f32 %v2184_v26, %v2610_v18  ;;  %v799_v23 = vmul.f32 %v2186_v20, %v2655_v48 }
 0x1c2   :  { %v3037_v13 = vpop.eup %2203  ;;  %v891_v43 = vadd.f32 %v3001_v39, %v867_v12  ;;  %v802_v51 = vadd.f32 %v798_v58, %v778_v50  ;;  %2215 = vpow2.f32 %v910_v49  ;;  %v823_v32 = vmul.f32 %v2984_v42, %v2685_v11  ;;  %v984_v11 = vld [vmem:[%s3579_s3 + $0x10] sm:$0xff] }
 0x1c3   :  { %v796_v7 = vadd.f32 %v3037_v13, %v3032_v3  ;;  %v769_v9 = vsub.f32 %v2862_v8, %v3035_v56  ;;  %v785_v53 = vsub.f32 %v2870_v19, %v3035_v56  ;;  %v3048_v37 = vpop.eup %2205  ;;  %v809_v18 = vsub.f32 %v2878_v25, %v3035_v56  ;;  %1010 = vrot.lane.b32.xlu2 %v984_v11, %s2296_s22 }
 0x1c4   :  { %v915_v15 = vadd.f32 %v3008_v2, %v891_v43  ;;  %v833_v48 = vsub.f32 %v2882_v59, %v3035_v56  ;;  %v3055_v26 = vpop.eup %2207  ;;  %v857_v19 = vsub.f32 %v2890_v61, %v3035_v56  ;;  %2217 = vpow2.f32 %v934_v14 }
 0x1c5   :  { %v820_v20 = vadd.f32 %v3048_v37, %v796_v7  ;;  %v776_v8 = vmul.f32 1.442695, %v769_v9  ;;  %v792_v17 = vmul.f32 1.442695, %v785_v53  ;;  %v3060_v38 = vpop.eup %2209  ;;  %v816_v34 = vmul.f32 1.442695, %v809_v18 }
 0x1c6   :  { %v939_v16 = vadd.f32 %v3015_v44, %v915_v15  ;;  %v803_v57 = vadd.f32 %v799_v23, %v779_v36  ;;  %v3063_v25 = vpop.eup %2211  ;;  %v881_v54 = vsub.f32 %v2902_v46, %v3035_v56  ;;  %v905_v50 = vsub.f32 %v2971_v31, %v3035_v56 }
 0x1c7   :  { %v844_v59 = vadd.f32 %v3055_v26, %v820_v20  ;;  %2219 = vpow2.f32 %v776_v8  ;;  %v3070_v58 = vpop.eup %2213  ;;  %v840_v61 = vmul.f32 1.442695, %v833_v48  ;;  %v847_v35 = vmul.f32 %v2989_v40, %v2698_v28 }
 0x1c8   :  { %2221 = vpow2.f32 %v792_v17  ;;  %v963_v33 = vadd.f32 %v3024_v30, %v939_v16  ;;  %v864_v49 = vmul.f32 1.442695, %v857_v19  ;;  %v3078_v46 = vpop.eup %2215  ;;  %v929_v31 = vsub.f32 %v2999_v4, %v3035_v56  ;;  %v3650_v16 = vld [vmem:[#allocation11_spill] sm:$0xff] }
 0x1c9   :  { %v868_v12 = vadd.f32 %v3060_v38, %v844_v59  ;;  %2223 = vpow2.f32 %v958_v6  ;;  %v826_v14 = vadd.f32 %v822_v1, %v802_v51  ;;  %v827_v43 = vadd.f32 %v823_v32, %v803_v57  ;;  %v3651_v59 = vld [vmem:[#allocation23_spill] sm:$0xff]  ;;  %v3653_v32 = vld [vmem:[#allocation14_spill] sm:$0xff] }
 0x1ca   :  { %2225 = vpow2.f32 %v816_v34  ;;  %v888_v42 = vmul.f32 1.442695, %v881_v54  ;;  %v912_v40 = vmul.f32 1.442695, %v905_v50  ;;  %v953_v6 = vsub.f32 %v3027_v52, %v3035_v56  ;;  %v3091_v36 = vpop.eup %2217  ;;  %v3652_v50 = vld [vmem:[#allocation12_spill] sm:$0xff] }
 0x1cb   :  { %v892_v28 = vadd.f32 %v3063_v25, %v868_v12  ;;  %2227 = vpow2.f32 %v840_v61  ;;  %v850_v4 = vadd.f32 %v846_v22, %v826_v14  ;;  %v851_v1 = vadd.f32 %v847_v35, %v827_v43  ;;  %v3656_v14 = vld [vmem:[#allocation25_spill] sm:$0xff] }
 0x1cc   :  { %2229 = vrcp.f32 %v963_v33  ;;  %v871_v9 = vmul.f32 %v2994_v55, %v2739_v63  ;;  %v936_v52 = vmul.f32 1.442695, %v929_v31  ;;  %v894_v51 = vmul.f32 %v2954_v60, %v2756_v27  ;;  %v985_v55 = vld [vmem:[%s3579_s3 + $0x18] sm:$0xff] }
 0x1cd   :  { %v2220_v23 = vpop.eup %2219  ;;  %v916_v7 = vadd.f32 %v3078_v46, %v892_v28  ;;  %2231 = vpow2.f32 %v864_v49  ;;  %v874_v56 = vadd.f32 %v870_v45, %v850_v4  ;;  %v895_v47 = vmul.f32 %v3001_v39, %v2752_v0  ;;  %1012 = vrot.lane.b32.xlu2 %v985_v55, %s2296_s22  ;;  %v3655_v49 = vld [vmem:[#allocation24_spill] sm:$0xff]  ;;  %v3662_v55 = vld [vmem:[#allocation19_spill] sm:$0xff] }
 0x1ce   :  { %v2222_v53 = vpop.eup %2221  ;;  %2233 = vpow2.f32 %v888_v42  ;;  %v875_v18 = vadd.f32 %v871_v9, %v851_v1  ;;  %v960_v48 = vmul.f32 1.442695, %v953_v6  ;;  %v918_v63 = vmul.f32 %v2959_v5, %v2795_v10  ;;  %v3657_v42 = vld [vmem:[#allocation16_spill] sm:$0xff]  ;;  %v3658_v6 = vld [vmem:[#allocation15_spill] sm:$0xff] }
 0x1cf   :  { %v3100_v15 = vpop.eup %2223  ;;  %v797_v22 = vadd.f32 %v2222_v53, %v2220_v23  ;;  %2235 = vpow2.f32 %v912_v40  ;;  %v898_v20 = vadd.f32 %v894_v51, %v874_v56  ;;  %v940_v27 = vadd.f32 %v3091_v36, %v916_v7 }
 0x1d0   :  { %v2226_v24 = vpop.eup %2225  ;;  %v899_v8 = vadd.f32 %v895_v47, %v875_v18  ;;  %v919_v17 = vmul.f32 %v3008_v2, %v2790_v62  ;;  %2237 = vpow2.f32 %v936_v52  ;;  %v942_v39 = vmul.f32 %v2965_v29, %v2807_v21  ;;  %v3654_v21 = vld [vmem:[#allocation13_spill] sm:$0xff]  ;;  %v3660_v52 = vld [vmem:[#allocation18_spill] sm:$0xff]  ;;  %v2124_v47 = vld [vmem:[%s3587_s11 + $0x74] sm:$0xf0] }
 0x1d1   :  { %v821_v60 = vadd.f32 %v2226_v24, %v797_v22  ;;  %v2228_v19 = vpop.eup %2227  ;;  %v922_v0 = vadd.f32 %v918_v63, %v898_v20  ;;  %v780_v10 = vmul.f32 %v3032_v3, %v3650_v16  ;;  %v943_v54 = vmul.f32 %v3015_v44, %v3651_v59  ;;  %v3666_v59 = vld [vmem:[#allocation27_spill] sm:$0xff] }
 0x1d2   :  { %v2230_v5 = vpop.eup %2229  ;;  %v923_v57 = vadd.f32 %v919_v17, %v899_v8  ;;  %v781_v61 = vmul.f32 %v2220_v23, %v3652_v50  ;;  %2239 = vpow2.f32 %v960_v48  ;;  %v800_v35 = vmul.f32 %v3037_v13, %v3653_v32  ;;  %v3664_v17 = vld [vmem:[#allocation22_spill] sm:$0xff] }
 0x1d3   :  { %v845_v34 = vadd.f32 %v2228_v19, %v821_v60  ;;  %v2232_v62 = vpop.eup %2231  ;;  %v946_v2 = vadd.f32 %v942_v39, %v922_v0  ;;  %v801_v29 = vmul.f32 %v2222_v53, %v3654_v21  ;;  %v966_v31 = vmul.f32 %v2968_v41, %v3655_v49  ;;  %v3659_v53 = vld [vmem:[#allocation17_spill] sm:$0xff]  ;;  %v2122_v39 = vld [vmem:[%s3587_s11 + $0x64] sm:$0xf0] }
 0x1d4   :  { %v2234_v33 = vpop.eup %2233  ;;  %v947_v12 = vadd.f32 %v943_v54, %v923_v57  ;;  %v967_v44 = vmul.f32 %v3024_v30, %v3656_v14  ;;  %v804_v11 = vadd.f32 %v800_v35, %v780_v10  ;;  %v824_v40 = vmul.f32 %v3048_v37, %v3657_v42  ;;  %v1982_v37 = vld [vmem:[%s3587_s11 + $0x70] sm:$0xf]  ;;  %v3663_v60 = vld [vmem:[#allocation5_spill] sm:$0xff] }
 0x1d5   :  { %v869_v3 = vadd.f32 %v2232_v62, %v845_v34  ;;  %v2236_v43 = vpop.eup %2235  ;;  %v805_v28 = vadd.f32 %v801_v29, %v781_v61  ;;  %v825_v4 = vmul.f32 %v2226_v24, %v3658_v6  ;;  %v970_v1 = vadd.f32 %v966_v31, %v946_v2  ;;  %1884 = vmatmul.msk.bf16.gmra.mxu0 %vm266_vm5, %v3663_v60  ;;  %v1974_v0 = vld [vmem:[%s3587_s11 + $0x60] sm:$0xf]  ;;  %v3667_v61 = vld [vmem:[#allocation26_spill] sm:$0xff]  ;;  %v3671_v31 = vld [vmem:[#allocation31_spill] sm:$0xff] }
 0x1d6   :  { %v971_v45 = vadd.f32 %v967_v44, %v947_v12  ;;  %v2238_v23 = vpop.eup %2237  ;;  %v828_v7 = vadd.f32 %v824_v40, %v804_v11  ;;  %v848_v41 = vmul.f32 %v3055_v26, %v3659_v53  ;;  %v849_v56 = vmul.f32 %v2228_v19, %v3660_v52  ;;  %v3661_v26 = vld [vmem:[#allocation20_spill] sm:$0xff]  ;;  %v3665_v10 = vld [vmem:[#allocation21_spill] sm:$0xff]  ;;  %v3670_v12 = vld [vmem:[#allocation30_spill] sm:$0xff] }
 0x1d7   :  { %v893_v13 = vadd.f32 %v2234_v33, %v869_v3  ;;  %v829_v9 = vadd.f32 %v825_v4, %v805_v28  ;;  %v964_v30 = vadd.f32 %v3100_v15, %v940_v27  ;;  %v978_v22 = vmul.f32 %v3070_v58, %v970_v1  ;;  %v3668_v21 = vld [vmem:[#allocation29_spill] sm:$0xff]  ;;  %v2120_v1 = vld [vmem:[%s3587_s11 + $0x54] sm:$0xf0]  ;;  %v1976_v52 = vld [vmem:[%s3587_s11 + $0x68] sm:$0xf0] }
 0x1d8   :  { %v979_v18 = vmul.f32 %v2230_v5, %v971_v45  ;;  %v2240_v24 = vpop.eup %2239  ;;  %v852_v48 = vadd.f32 %v848_v41, %v828_v7  ;;  %v872_v63 = vmul.f32 %v3060_v38, %v3661_v26  ;;  %v873_v27 = vmul.f32 %v2232_v62, %v3662_v55  ;;  %v2123_v7 = vld [vmem:[%s3587_s11 + $0x74] sm:$0xf]  ;;  %v2121_v53 = vld [vmem:[%s3587_s11 + $0x64] sm:$0xf]  ;;  %v3674_v26 = vld [vmem:[#allocation8_spill] sm:$0xff] }
 0x1d9   :  { %v917_v51 = vadd.f32 %v2236_v43, %v893_v13  ;;  %v853_v20 = vadd.f32 %v849_v56, %v829_v9  ;;  %v896_v19 = vmul.f32 %v3063_v25, %v3664_v17  ;;  %v897_v5 = vmul.f32 %v2234_v33, %v3665_v10  ;;  %v3669_v33 = vld [vmem:[#allocation28_spill] sm:$0xff]  ;;  %v1966_v13 = vld [vmem:[%s3587_s11 + $0x50] sm:$0xf]  ;;  %v1944_v17 = vld [vmem:[%s3587_s11 + $0x28] sm:$0xf0] }
 0x1da   :  { %v2153_v8 = vpack.i.bf16 %v979_v18, %v978_v22  ;;  %v876_v16 = vadd.f32 %v872_v63, %v852_v48  ;;  %v1983_v34 = vor.u32 %v2124_v47, %v1982_v37  ;;  %2241 = vrcp.f32 %v964_v30  ;;  %v1984_v9 = vld [vmem:[%s3587_s11 + $0x78] sm:$0xf0]  ;;  %v2119_v30 = vld [vmem:[%s3587_s11 + $0x54] sm:$0xf]  ;;  %v2117_v18 = vld [vmem:[%s3587_s11 + $0x44] sm:$0xf] }
 0x1db   :  { %v941_v58 = vadd.f32 %v2238_v23, %v917_v51  ;;  %v877_v38 = vadd.f32 %v873_v27, %v853_v20  ;;  %v920_v25 = vmul.f32 %v3078_v46, %v3666_v59  ;;  %v921_v62 = vmul.f32 %v2236_v43, %v3667_v61  ;;  %v982_v46 = vld [vmem:[%s3579_s3] sm:$0xff]  ;;  %v1968_v51 = vld [vmem:[%s3587_s11 + $0x58] sm:$0xf0]  ;;  %v1960_v37 = vld [vmem:[%s3587_s11 + $0x48] sm:$0xf0] }
 0x1dc   :  { %2154 = vrot.lane.b32.xlu0 %v2153_v8, %s2296_s22  ;;  %v900_v54 = vadd.f32 %v896_v19, %v876_v16  ;;  %1126 = vmatpush.bf16.msra.mxu0 %v1983_v34  ;;  %v1975_v2 = vor.u32 %v2122_v39, %v1974_v0  ;;  %v944_v29 = vmul.f32 %v3091_v36, %v3668_v21  ;;  %v2118_v48 = vld [vmem:[%s3587_s11 + $0x44] sm:$0xf0]  ;;  %v2115_v63 = vld [vmem:[%s3587_s11 + $0x34] sm:$0xf]  ;;  %v1952_v55 = vld [vmem:[%s3587_s11 + $0x38] sm:$0xf0] }
 0x1dd   :  { %v965_v57 = vadd.f32 %v2240_v24, %v941_v58  ;;  %v901_v50 = vadd.f32 %v897_v5, %v877_v38  ;;  %v945_v3 = vmul.f32 %v2238_v23, %v3669_v33  ;;  %v968_v49 = vmul.f32 %v3100_v15, %v3670_v12  ;;  %v3672_v15 = vld [vmem:[#allocation6_spill] sm:$0xff]  ;;  %v3673_v23 = vld [vmem:[#allocation7_spill] sm:$0xff]  ;;  %v2116_v58 = vld [vmem:[%s3587_s11 + $0x34] sm:$0xf0] }
 0x1de   :  { %v924_v32 = vadd.f32 %v920_v25, %v900_v54  ;;  %v969_v14 = vmul.f32 %v2240_v24, %v3671_v31  ;;  %v1967_v45 = vor.u32 %v2120_v1, %v1966_v13  ;;  %v1987_v41 = vor.u32 %v2123_v7, %v1984_v9  ;;  %v1958_v24 = vld [vmem:[%s3587_s11 + $0x40] sm:$0xf]  ;;  %v1950_v27 = vld [vmem:[%s3587_s11 + $0x30] sm:$0xf]  ;;  %v2113_v8 = vld [vmem:[%s3587_s11 + $0x24] sm:$0xf] }
 0x1df   :  { %2243 = vrcp.f32 %v965_v57  ;;  %v925_v35 = vadd.f32 %v921_v62, %v901_v50  ;;  %v1979_v56 = vor.u32 %v2121_v53, %v1976_v52  ;;  %v1971_v22 = vor.u32 %v2119_v30, %v1968_v51  ;;  %v3675_v39 = vld [vmem:[#allocation9_spill] sm:$0xff]  ;;  %v3676_v16 = vld [vmem:[#allocation10_spill] sm:$0xff]  ;;  %v2111_v34 = vld [vmem:[%s3587_s11 + $0x14] sm:$0xf] }
 0x1e0   :  { %v948_v44 = vadd.f32 %v944_v29, %v924_v32  ;;  %1127 = vmatpush.bf16.msra.mxu0 %v1975_v2  ;;  %v2242_v11 = vpop.eup %2241  ;;  %1145 = vmatpush.bf16.msra.mxu1 %v1987_v41  ;;  %v1963_v47 = vor.u32 %v2117_v18, %v1960_v37  ;;  %v1959_v20 = vor.u32 %v2118_v48, %v1958_v24  ;;  %v1942_v38 = vld [vmem:[%s3587_s11 + $0x20] sm:$0xf]  ;;  %v2114_v10 = vld [vmem:[%s3587_s11 + $0x24] sm:$0xf0]  ;;  %v1936_v57 = vld [vmem:[%s3587_s11 + $0x18] sm:$0xf0]  ;;  %v3258_v2 = vpop.f32.mrf.mxu0 }
 0x1e1   :  { %v949_v43 = vadd.f32 %v945_v3, %v925_v35  ;;  %v1955_v60 = vor.u32 %v2115_v63, %v1952_v55  ;;  %v1951_v19 = vor.u32 %v2116_v58, %v1950_v27  ;;  %v1947_v0 = vor.u32 %v2113_v8, %v1944_v17  ;;  %v1934_v59 = vld [vmem:[%s3587_s11 + $0x10] sm:$0xf]  ;;  %v2112_v54 = vld [vmem:[%s3587_s11 + $0x14] sm:$0xf0]  ;;  %v2109_v50 = vld [vmem:[%s3587_s11 + $0x4] sm:$0xf] }
 0x1e2   :  { %v972_v28 = vadd.f32 %v968_v49, %v948_v44  ;;  %v1943_v5 = vor.u32 %v2114_v10, %v1942_v38  ;;  %v1939_v25 = vor.u32 %v2111_v34, %v1936_v57  ;;  %v1928_v61 = vld [vmem:[%s3587_s11 + $0x8] sm:$0xf0]  ;;  %v1935_v62 = vor.u32 %v2112_v54, %v1934_v59  ;;  %v1926_v35 = vld [vmem:[%s3587_s11] sm:$0xf]  ;;  %v2110_v21 = vld [vmem:[%s3587_s11 + $0x4] sm:$0xf0] }
 0x1e3   :  { %v973_v42 = vadd.f32 %v969_v14, %v949_v43  ;;  %v1931_v32 = vor.u32 %v2109_v50, %v1928_v61  ;;  %v1927_v29 = vor.u32 %v2110_v21, %v1926_v35  ;;  %v1040_v37 = vld [vmem:[%s3588_s12] sm:$0x3]  ;;  %s1828_s11 = sshll.u32 %s3592_s16, 4  ;;  %s2299_s12 = smov 8   ;;  %s1829_s11 = int_to_ptr.hbm [resolvable:$true] %s1828_s11 }
 0x1e4   :  { %1006 = vrot.lane.b32.xlu0 %v982_v46, %s2296_s22  ;;  %v980_v36 = vmul.f32 %v2242_v11, %v972_v28  ;;  %1128 = vmatpush.bf16.msra.mxu0 %v1967_v45  ;;  %v1043_v24 = vperm.slane %v1040_v37, 1  ;;  %v1042_v38 = vperm.slane %v1040_v37, 0 }
 0x1e5   :  { %v2244_v40 = vpop.eup %2243  ;;  %1885 = vmatmul.msk.bf16.gmra.mxu0 %vm266_vm5, %v3672_v15  ;;  %1146 = vmatpush.bf16.msra.mxu1 %v1979_v56 }
 0x1e6   :  { %v981_v6 = vmul.f32 %v2244_v40, %v973_v42 }
 0x1e8   :  { %v2158_v4 = vpack.i.bf16 %v981_v6, %v980_v36  ;;  %1129 = vmatpush.bf16.msra.mxu0 %v1959_v20  ;;  %v3266_v33 = vpop.f32.mrf.mxu0 }
 0x1e9   :  { %1147 = vmatpush.bf16.msra.mxu1 %v1971_v22 }
 0x1ea   :  { %2159 = vrot.lane.b32.xlu1 %v2158_v4, %s2296_s22 }
 0x1ec   :  { %1130 = vmatpush.bf16.msra.mxu0 %v1951_v19 }
 0x1ed   :  { %1148 = vmatpush.bf16.msra.mxu1 %v1963_v47 }
 0x1f0   :  { %1131 = vmatpush.bf16.msra.mxu0 %v1943_v5  ;;  %v3268_v3 = vpop.f32.mrf.mxu0 }
 0x1f1   :  { %1149 = vmatpush.bf16.msra.mxu1 %v1955_v60 }
 0x1f4   :  { %1132 = vmatpush.bf16.msra.mxu0 %v1935_v62 }
 0x1f5   :  { %1886 = vmatmul.msk.bf16.gmra.mxu0 %vm266_vm5, %v3673_v23  ;;  %1150 = vmatpush.bf16.msra.mxu1 %v1947_v0 }
 0x1f8   :  { %1133 = vmatpush.bf16.msra.mxu0 %v1927_v29  ;;  %v3270_v49 = vpop.f32.mrf.mxu0 }
 0x1f9   :  { %1151 = vmatpush.bf16.msra.mxu1 %v1939_v25 }
 0x1fd   :  { %1152 = vmatpush.bf16.msra.mxu1 %v1931_v32 }
 0x200   :  { %v3282_v40 = vpop.f32.mrf.mxu0 }
 0x205   :  { %1887 = vmatmul.msk.bf16.gmra.mxu0 %vm266_vm5, %v3674_v26 }
 0x208   :  { %v3290_v45 = vpop.f32.mrf.mxu0 }
 0x210   :  { %v3292_v7 = vpop.f32.mrf.mxu0 }
 0x215   :  { %1888 = vmatmul.msk.bf16.gmra.mxu0 %vm266_vm5, %v3675_v39 }
 0x218   :  { %v3294_v9 = vpop.f32.mrf.mxu0 }
 0x21d   :  { %v3280_v42 = vpop.permute.xlu2 %1010 }
 0x225   :  { %1889 = vmatmul.msk.bf16.gmra.mxu0 %vm266_vm5, %v3676_v16 }
 0x227   :  { %v3284_v15 = vpop.permute.xlu2 %1012 }
 0x22f   :  { %v3272_v14 = vpop.permute.xlu1 %1008 }
 0x24e   :  { %v2155_v12 = vpop.permute.xlu0 %2154 }
 0x24f   :  { %v2157_v31 = vunpack.i.h.bf16 %v2155_v12  ;;  %v2156_v46 = vunpack.i.l.bf16 %v2155_v12 }
 0x251   :  { %v1019_v43 = vsel %vm460_vm6, %v2157_v31, %v3272_v14 }
 0x252   :  { %v3296_v53 = vpop.f32.mrf.mxu0 }
 0x256   :  { %v3274_v44 = vpop.permute.xlu0 %1006 }
 0x257   :  { %v1018_v11 = vsel %vm460_vm6, %v2156_v46, %v3274_v44 }
 0x258   :  { %v1038_v28 = vpack.c.bf16 %v1019_v43, %v1018_v11 }
 0x25a   :  { %1134 = vmatmul.bf16.vlgmr.msra.gmra.mxu0 %v1038_v28  ;;  %1153 = vmatmul.bf16.vlgmr.msra.gmra.mxu1 %v1038_v28  ;;  %v3298_v41 = vpop.f32.mrf.mxu0 }
 0x25c   :  { %v2160_v36 = vpop.permute.xlu1 %2159 }
 0x25d   :  { %v2162_v6 = vunpack.i.h.bf16 %v2160_v36  ;;  %v2161_v4 = vunpack.i.l.bf16 %v2160_v36 }
 0x25f   :  { %v1020_v13 = vsel %vm460_vm6, %v2161_v4, %v3280_v42  ;;  %v1021_v1 = vsel %vm460_vm6, %v2162_v6, %v3284_v15 }
 0x260   :  { %v1039_v23 = vpack.c.bf16 %v1021_v1, %v1020_v13 }
 0x262   :  { %v3300_v52 = vpop.f32.mrf.mxu0 }
 0x26a   :  { %1139 = vmatmul.bf16.gmra.mxu0 %v1039_v23  ;;  %1158 = vmatmul.bf16.gmra.mxu1 %v1039_v23  ;;  %v3302_v56 = vpop.f32.mrf.mxu0 }
 0x272   :  { %v3304_v30 = vpop.f32.mrf.mxu0 }
 0x27a   :  { %v3306_v51 = vpop.f32.mrf.mxu0 }
 0x282   :  { %v3308_v22 = vpop.f32.mrf.mxu0 }
 0x28a   :  { %v3310_v18 = vpop.f32.mrf.mxu0 }
 0x292   :  { %v3315_v47 = vpop.f32.mrf.mxu0 }
 0x29a   :  { %v3321_v26 = vpop.f32.mrf.mxu0 }
 0x2a2   :  { %v3327_v60 = vpop.f32.mrf.mxu0 }
 0x2aa   :  { %v3332_v19 = vpop.f32.mrf.mxu0 }
 0x2d7   :  { %v1154_v48 = vpop.f32.mrf.mxu1  ;;  %v1135_v0 = vpop.f32.mrf.mxu0 }
 0x2d8   :  { %v3317_v20 = vadd.f32 %v1154_v48, %v1043_v24  ;;  %v1136_v34 = vadd.f32 %v1135_v0, %v1042_v38 }
 0x2da   :  { %1244 = vrot.lane.b32.xlu0 %v3317_v20, %s2296_s22  ;;  %v1988_v57 = vmul.f32 -1.442695, %v1136_v34 }
 0x2df   :  { %v1156_v63 = vpop.f32.mrf.mxu1  ;;  %v1137_v39 = vpop.f32.mrf.mxu0 }
 0x2e0   :  { %v3323_v55 = vadd.f32 %v1156_v63, %v1043_v24  ;;  %v1138_v25 = vadd.f32 %v1137_v39, %v1042_v38 }
 0x2e2   :  { %1246 = vrot.lane.b32.xlu1 %v3323_v55, %s2296_s22  ;;  %v1989_v50 = vmul.f32 -1.442695, %v1138_v25 }
 0x2e7   :  { %v1159_v27 = vpop.f32.mrf.mxu1  ;;  %v1140_v16 = vpop.f32.mrf.mxu0 }
 0x2e8   :  { %v1160_v58 = vadd.f32 %v1159_v27, %v1043_v24  ;;  %v1141_v10 = vadd.f32 %v1140_v16, %v1042_v38 }
 0x2ea   :  { %1248 = vrot.lane.b32.xlu2 %v1160_v58, %s2296_s22  ;;  %v1990_v5 = vmul.f32 -1.442695, %v1141_v10 }
 0x2ec   :  { %2245 = vpow2.f32 %v1990_v5 }
 0x2ed   :  { %2247 = vpow2.f32 %v1988_v57 }
 0x2ef   :  { %v1161_v8 = vpop.f32.mrf.mxu1  ;;  %v1142_v35 = vpop.f32.mrf.mxu0 }
 0x2f0   :  { %v3330_v17 = vadd.f32 %v1161_v8, %v1043_v24  ;;  %v1143_v12 = vadd.f32 %v1142_v35, %v1042_v38 }
 0x2f2   :  { %1250 = vrot.lane.b32.xlu0 %v3330_v17, %s2296_s22  ;;  %v2246_v59 = vpop.eup %2245  ;;  %v1991_v11 = vmul.f32 -1.442695, %v1143_v12 }
 0x2f3   :  { %v1178_v54 = vadd.f32 1.0, %v2246_v59  ;;  %v2248_v61 = vpop.eup %2247 }
 0x2f4   :  { %v1176_v62 = vadd.f32 1.0, %v2248_v61 }
 0x2f5   :  { %2249 = vrcp.f32 %v1178_v54  ;;  %v1221_v1 = vand.u32 2147483648, %v1178_v54  ;;  %vm1215_vm8 = vweird.f32 %v1178_v54  ;;  %v1219_v23 = vand.u32 2147483647, %v1178_v54 }
 0x2f6   :  { %2251 = vpow2.f32 %v1989_v50  ;;  %v1191_v5 = vand.u32 2147483648, %v1176_v62  ;;  %vm1185_vm12 = vweird.f32 %v1176_v62  ;;  %v1189_v57 = vand.u32 2147483647, %v1176_v62 }
 0x2f7   :  { %2253 = vrcp.f32 %v1176_v62  ;;  %v1222_v27 = vor.u32 1.1754944e-38, %v1221_v1  ;;  %vm1220_vm10 = vcmp.eq.f32.partialorder %v1219_v23, 8.507059e+37 }
 0x2f8   :  { %vm1190_vm14 = vcmp.eq.f32.partialorder %v1189_v57, 8.507059e+37 }
 0x2fb   :  { %v2250_v32 = vpop.eup %2249 }
 0x2fc   :  { %v2252_v21 = vpop.eup %2251  ;;  %v1211_v29 = vmul.f32 %v2250_v32, %v1178_v54  ;;  %vm1216_vm7 = vweird.f32 %v2250_v32  ;;  %v1192_v54 = vor.u32 1.1754944e-38, %v1191_v5 }
 0x2fd   :  { %v1177_v31 = vadd.f32 1.0, %v2252_v21  ;;  %v2254_v43 = vpop.eup %2253  ;;  %vm1217_vm9 = vmor %vm1215_vm8, %vm1216_vm7 }
 0x2fe   :  { %v1212_v46 = vsub.f32 1.0, %v1211_v29  ;;  %v1181_v36 = vmul.f32 %v2254_v43, %v1176_v62  ;;  %vm1186_vm11 = vweird.f32 %v2254_v43 }
 0x2ff   :  { %2255 = vrcp.f32 %v1177_v31  ;;  %vm1187_vm13 = vmor %vm1185_vm12, %vm1186_vm11  ;;  %v1206_v29 = vand.u32 2147483648, %v1177_v31  ;;  %vm1200_vm0 = vweird.f32 %v1177_v31  ;;  %v1204_v62 = vand.u32 2147483647, %v1177_v31 }
 0x300   :  { %v1213_v28 = vmul.f32 %v2250_v32, %v1212_v46  ;;  %2257 = vpow2.f32 %v1991_v11  ;;  %v1182_v4 = vsub.f32 1.0, %v1181_v36 }
 0x301   :  { %v1207_v11 = vor.u32 1.1754944e-38, %v1206_v29  ;;  %vm1205_vm2 = vcmp.eq.f32.partialorder %v1204_v62, 8.507059e+37 }
 0x302   :  { %v1214_v6 = vadd.f32 %v2250_v32, %v1213_v28  ;;  %v1183_v48 = vmul.f32 %v2254_v43, %v1182_v4 }
 0x304   :  { %v1218_v24 = vsel %vm1217_vm9, %v2250_v32, %v1214_v6  ;;  %v1184_v38 = vadd.f32 %v2254_v43, %v1183_v48 }
 0x305   :  { %v2256_v13 = vpop.eup %2255  ;;  %v3336_v39 = vsel %vm1220_vm10, %v1222_v27, %v1218_v24 }
 0x306   :  { %v2258_v37 = vpop.eup %2257  ;;  %v1196_v63 = vmul.f32 %v2256_v13, %v1177_v31  ;;  %v1188_v59 = vsel %vm1187_vm13, %v2254_v43, %v1184_v38  ;;  %vm1201_vm15 = vweird.f32 %v2256_v13 }
 0x307   :  { %v1179_v8 = vadd.f32 1.0, %v2258_v37  ;;  %v3339_v50 = vsel %vm1190_vm14, %v1192_v54, %v1188_v59  ;;  %vm1202_vm1 = vmor %vm1200_vm0, %vm1201_vm15 }
 0x308   :  { %v1197_v10 = vsub.f32 1.0, %v1196_v63  ;;  %v1268_v54 = vsub.f32 1.0, %v3339_v50 }
 0x309   :  { %2259 = vrcp.f32 %v1179_v8  ;;  %v1236_v37 = vand.u32 2147483648, %v1179_v8  ;;  %vm1230_vm4 = vweird.f32 %v1179_v8 }
 0x30a   :  { %v1198_v25 = vmul.f32 %v2256_v13, %v1197_v10  ;;  %v2269_v10 = vld [vmem:[%s3585_s9] sm:$0x3] }
 0x30b   :  { %v1237_v63 = vor.u32 1.1754944e-38, %v1236_v37 }
 0x30c   :  { %v1199_v35 = vadd.f32 %v2256_v13, %v1198_v25 }
 0x30e   :  { %v1203_v46 = vsel %vm1202_vm1, %v2256_v13, %v1199_v35  ;;  %v1234_v13 = vand.u32 2147483647, %v1179_v8 }
 0x30f   :  { %v2260_v21 = vpop.eup %2259  ;;  %v1208_v28 = vsel %vm1205_vm2, %v1207_v11, %v1203_v46  ;;  %v1294_v46 = vmul.f32 %v3336_v39, %v3280_v42  ;;  %v2128_v42 = vld [vmem:[%s3589_s13 + $0x18] sm:$0xff] }
 0x310   :  { %v1226_v43 = vmul.f32 %v2260_v21, %v1179_v8  ;;  %vm1231_vm3 = vweird.f32 %v2260_v21  ;;  %vm1235_vm7 = vcmp.eq.f32.partialorder %v1234_v13, 8.507059e+37  ;;  %v3352_v8 = vperm.slane %v2269_v10, 1  ;;  %1354 = vmatpush.bf16.msra.mxu2 %v2128_v42 }
 0x311   :  { %vm1232_vm5 = vmor %vm1230_vm4, %vm1231_vm3  ;;  %v1269_v25 = vsub.f32 1.0, %v1208_v28 }
 0x312   :  { %v1227_v4 = vsub.f32 1.0, %v1226_v43  ;;  %v373_v5 = vadd.f32 %v3258_v2, %v3352_v8  ;;  %v415_v57 = vadd.f32 %v3321_v26, %v3352_v8  ;;  %v388_v2 = vadd.f32 %v3292_v7, %v3352_v8 }
 0x313   :  { %v375_v29 = vadd.f32 %v3266_v33, %v3352_v8 }
 0x344   :  { %v1249_v0 = vpop.permute.xlu2 %1248 }
 0x345   :  { %v1258_v16 = vmul.f32 %v1249_v0, %v3336_v39 }
 0x347   :  { %v1262_v34 = vadd.f32 %v1258_v16, %v1160_v58 }
 0x349   :  { %2261 = vtanh.f32 %v1262_v34  ;;  %v380_v34 = vadd.f32 %v3270_v49, %v3352_v8 }
 0x34c   :  { %v1245_v61 = vpop.permute.xlu0 %1244 }
 0x34d   :  { %v1256_v32 = vmul.f32 %v1245_v61, %v3339_v50 }
 0x34f   :  { %v2262_v12 = vpop.eup %2261  ;;  %v1260_v58 = vadd.f32 %v1256_v32, %v3317_v20  ;;  %v1228_v20 = vmul.f32 %v2260_v21, %v1227_v4  ;;  %v1292_v32 = vmul.f32 %v3339_v50, %v3274_v44  ;;  %v1270_v44 = vsub.f32 1.0, %v3336_v39 }
 0x350   :  { %1280 = vrot.lane.b32.xlu0 %v2262_v12, %s2296_s22  ;;  %v393_v39 = vadd.f32 %v3296_v53, %v3352_v8  ;;  %v408_v4 = vadd.f32 %v3308_v22, %v3352_v8  ;;  %v390_v53 = vadd.f32 %v3294_v9, %v3352_v8  ;;  %v395_v22 = vadd.f32 %v3298_v41, %v3352_v8 }
 0x351   :  { %2263 = vtanh.f32 %v1260_v58  ;;  %v1229_v31 = vadd.f32 %v2260_v21, %v1228_v20  ;;  %v410_v9 = vadd.f32 %v3310_v18, %v3352_v8  ;;  %v400_v41 = vadd.f32 %v3302_v56, %v3352_v8 }
 0x353   :  { %v1233_v48 = vsel %vm1232_vm5, %v2260_v21, %v1229_v31 }
 0x354   :  { %v1247_v36 = vpop.permute.xlu1 %1246  ;;  %v1238_v0 = vsel %vm1235_vm7, %v1237_v63, %v1233_v48  ;;  %v2164_v63 = vld [vmem:[%s3590_s14] ss:$0 sm:$0xff] }
 0x355   :  { %v1257_v6 = vmul.f32 %v1247_v36, %v1208_v28  ;;  %v1271_v58 = vsub.f32 1.0, %v1238_v0  ;;  %v1295_v43 = vmul.f32 %v1238_v0, %v3284_v15  ;;  %v378_v15 = vadd.f32 %v3268_v3, %v3352_v8  ;;  %v2126_v3 = vld [vmem:[%s3589_s13 + $0x8] sm:$0xff] }
 0x357   :  { %v2264_v1 = vpop.eup %2263  ;;  %v1261_v23 = vadd.f32 %v1257_v6, %v3323_v55  ;;  %v405_v6 = vadd.f32 %v3306_v51, %v3352_v8  ;;  %v2125_v51 = vld [vmem:[%s3589_s13] sm:$0xff] }
 0x358   :  { %1276 = vrot.lane.b32.xlu1 %v2264_v1, %s2296_s22  ;;  %v413_v1 = vadd.f32 %v3315_v47, %v3352_v8  ;;  %v418_v47 = vadd.f32 %v3327_v60, %v3352_v8 }
 0x359   :  { %2265 = vtanh.f32 %v1261_v23  ;;  %v398_v23 = vadd.f32 %v3300_v52, %v3352_v8 }
 0x35f   :  { %v2266_v24 = vpop.eup %2265 }
 0x360   :  { %1278 = vrot.lane.b32.xlu2 %v2266_v24, %s2296_s22 }
 0x364   :  { %v1251_v27 = vpop.permute.xlu0 %1250 }
 0x365   :  { %v1259_v16 = vmul.f32 %v1251_v27, %v1238_v0 }
 0x367   :  { %v1263_v55 = vadd.f32 %v1259_v16, %v3330_v17  ;;  %v383_v17 = vadd.f32 %v3282_v40, %v3352_v8  ;;  %v1293_v40 = vmul.f32 %v1208_v28, %v3272_v14  ;;  %v403_v14 = vadd.f32 %v3304_v30, %v3352_v8 }
 0x368   :  { %v385_v30 = vadd.f32 %v3290_v45, %v3352_v8  ;;  %v2127_v45 = vld [vmem:[%s3589_s13 + $0x10] sm:$0xff] }
 0x369   :  { %2267 = vtanh.f32 %v1263_v55  ;;  %1355 = vmatpush.bf16.msra.mxu2 %v2127_v45 }
 0x36d   :  { %1356 = vmatpush.bf16.msra.mxu2 %v2126_v3 }
 0x36f   :  { %v2268_v38 = vpop.eup %2267 }
 0x370   :  { %1282 = vrot.lane.b32.xlu1 %v2268_v38, %s2296_s22 }
 0x371   :  { %1357 = vmatpush.bf16.msra.mxu2 %v2125_v51 }
 0x378   :  { %1373 = vrot.lane.b32.xlu1 %v373_v5, %s2296_s22 }
 0x380   :  { %1379 = vrot.lane.b32.xlu1 %v380_v34, %s2296_s22 }
 0x388   :  { %1462 = vrot.lane.b32.xlu1 %v383_v17, %s2296_s22 }
 0x390   :  { %1731 = vrot.lane.b32.xlu1 %v415_v57, %s2296_s22 }
 0x398   :  { %1466 = vrot.lane.b32.xlu1 %v388_v2, %s2296_s22 }
 0x3ba   :  { %v1279_v59 = vpop.permute.xlu2 %1278 }
 0x3bb   :  { %v1289_v49 = vmul.f32 %v1279_v59, %v1269_v25 }
 0x3bd   :  { %v3373_v26 = vadd.f32 %v1293_v40, %v1289_v49 }
 0x3c2   :  { %v1281_v12 = vpop.permute.xlu0 %1280 }
 0x3c3   :  { %v1290_v50 = vmul.f32 %v1281_v12, %v1270_v44  ;;  %v2140_v44 = vld [vmem:[%s3591_s15 + $0x58] sm:$0xff] }
 0x3c4   :  { %1617 = vmatpush.bf16.msrb.mxu1 %v2140_v44 }
 0x3c5   :  { %v3390_v33 = vadd.f32 %v1294_v46, %v1290_v50 }
 0x3ca   :  { %v1277_v61 = vpop.permute.xlu1 %1276 }
 0x3cb   :  { %v1288_v35 = vmul.f32 %v1277_v61, %v1268_v54 }
 0x3cd   :  { %v3375_v21 = vadd.f32 %v1292_v32, %v1288_v35  ;;  %v420_v35 = vadd.f32 %v3332_v19, %v3352_v8  ;;  %v2143_v19 = vld [vmem:[%s3591_s15 + $0x70] sm:$0xff] }
 0x3ce   :  { %v2139_v8 = vld [vmem:[%s3591_s15 + $0x50] sm:$0xff] }
 0x3cf   :  { %v1308_v7 = vpack.c.bf16 %v3373_v26, %v3375_v21  ;;  %1618 = vmatpush.bf16.msrb.mxu1 %v2139_v8 }
 0x3d1   :  { %1316 = vrot.lane.b32.xlu2 %v1308_v7, %s2296_s22 }
 0x3d9   :  { %1375 = vrot.lane.b32.xlu2 %v375_v29, %s2296_s22 }
 0x3e1   :  { %1640 = vrot.lane.b32.xlu2 %v403_v14, %s2296_s22  ;;  %v2144_v14 = vld [vmem:[%s3591_s15 + $0x78] sm:$0xff] }
 0x3e2   :  { %v1283_v62 = vpop.permute.xlu1 %1282  ;;  %1706 = vmatpush.bf16.msrb.mxu2 %v2144_v14 }
 0x3e3   :  { %v1291_v11 = vmul.f32 %v1283_v62, %v1271_v58  ;;  %v2142_v58 = vld [vmem:[%s3591_s15 + $0x68] sm:$0xff] }
 0x3e5   :  { %v3392_v28 = vadd.f32 %v1295_v43, %v1291_v11 }
 0x3e6   :  { %1707 = vmatpush.bf16.msrb.mxu2 %v2143_v19 }
 0x3e7   :  { %v1309_v36 = vpack.c.bf16 %v3392_v28, %v3390_v33 }
 0x3e9   :  { %1464 = vrot.lane.b32.xlu2 %v385_v30, %s2296_s22  ;;  %1318 = vrot.lane.b32.xlu0 %v1309_v36, %s2296_s22  ;;  %v2141_v36 = vld [vmem:[%s3591_s15 + $0x60] sm:$0xff] }
 0x3ea   :  { %v1374_v18 = vpop.permute.xlu1 %1373  ;;  %1708 = vmatpush.bf16.msrb.mxu2 %v2142_v58 }
 0x3ee   :  { %1709 = vmatpush.bf16.msrb.mxu2 %v2141_v36 }
 0x3f1   :  { %1551 = vrot.lane.b32.xlu2 %v393_v39, %s2296_s22  ;;  %1377 = vrot.lane.b32.xlu0 %v378_v15, %s2296_s22 }
 0x3f2   :  { %v1380_v13 = vpop.permute.xlu1 %1379 }
 0x3f9   :  { %1644 = vrot.lane.b32.xlu2 %v408_v4, %s2296_s22  ;;  %1642 = vrot.lane.b32.xlu0 %v405_v6, %s2296_s22 }
 0x3fa   :  { %v1463_v16 = vpop.permute.xlu1 %1462 }
 0x401   :  { %1468 = vrot.lane.b32.xlu2 %v390_v53, %s2296_s22  ;;  %1729 = vrot.lane.b32.xlu0 %v413_v1, %s2296_s22 }
 0x402   :  { %v1732_v3 = vpop.permute.xlu1 %1731 }
 0x409   :  { %1555 = vrot.lane.b32.xlu2 %v398_v23, %s2296_s22  ;;  %1553 = vrot.lane.b32.xlu0 %v395_v22, %s2296_s22 }
 0x411   :  { %1646 = vrot.lane.b32.xlu0 %v410_v9, %s2296_s22 }
 0x419   :  { %1733 = vrot.lane.b32.xlu0 %v418_v47, %s2296_s22 }
 0x421   :  { %1557 = vrot.lane.b32.xlu0 %v400_v41, %s2296_s22 }
 0x42b   :  { %v1317_v52 = vpop.permute.xlu2 %1316 }
 0x42c   :  { %2008 = vmatmul.msk.bf16.vlgmr.msra.gmra.mxu2 %vm460_vm6, %v1317_v52 }
 0x433   :  { %v1376_v37 = vpop.permute.xlu2 %1375 }
 0x43b   :  { %v1641_v48 = vpop.permute.xlu2 %1640 }
 0x443   :  { %v1465_v55 = vpop.permute.xlu2 %1464 }
 0x44b   :  { %v1552_v40 = vpop.permute.xlu2 %1551 }
 0x453   :  { %v1645_v12 = vpop.permute.xlu2 %1644 }
 0x45b   :  { %v1319_v20 = vpop.permute.xlu0 %1318  ;;  %v1469_v43 = vpop.permute.xlu2 %1468 }
 0x45c   :  { %2009 = vmatmul.msk.bf16.gmra.mxu2 %vm460_vm6, %v1319_v20  ;;  %v1467_v20 = vpop.permute.xlu1 %1466 }
 0x463   :  { %v1378_v31 = vpop.permute.xlu0 %1377  ;;  %v1556_v22 = vpop.permute.xlu2 %1555 }
 0x46b   :  { %v1643_v24 = vpop.permute.xlu0 %1642 }
 0x473   :  { %v1730_v27 = vpop.permute.xlu0 %1729 }
 0x47b   :  { %v1554_v54 = vpop.permute.xlu0 %1553 }
 0x483   :  { %v1647_v29 = vpop.permute.xlu0 %1646 }
 0x48b   :  { %v1734_v62 = vpop.permute.xlu0 %1733 }
 0x493   :  { %v1558_v53 = vpop.permute.xlu0 %1557 }
 0x4af   :  { %v1359_v60 = vpop.f32.mrf.mxu2 }
 0x4b0   :  { %v3450_v56 = vadd.f32 %v2164_v63, %v1359_v60  ;;  %v2131_v60 = vld [vmem:[%s3591_s15 + $0x10] sm:$0xff] }
 0x4b2   :  { %v1385_v10 = vmul.f32 %v1374_v18, %v3450_v56  ;;  %v1474_v5 = vmul.f32 %v1463_v16, %v3450_v56  ;;  %v1652_v57 = vmul.f32 %v1641_v48, %v3450_v56  ;;  %v1563_v32 = vmul.f32 %v1552_v40, %v3450_v56  ;;  %v2138_v18 = vld [vmem:[%s3591_s15 + $0x48] sm:$0xff]  ;;  %v2136_v48 = vld [vmem:[%s3591_s15 + $0x38] sm:$0xff]  ;;  %v2129_v16 = vld [vmem:[%s3591_s15] sm:$0xff] }
 0x4b3   :  { %v1741_v23 = vmul.f32 %v1730_v27, %v3450_v56  ;;  %1619 = vmatpush.bf16.msrb.mxu1 %v2138_v18  ;;  %1528 = vmatpush.bf16.msrb.mxu0 %v2136_v48  ;;  %v2130_v27 = vld [vmem:[%s3591_s15 + $0x8] sm:$0xff]  ;;  %v2145_v40 = vld [vmem:[%s3591_s15 + $0x80] sm:$0xff] }
 0x4b7   :  { %v1361_v0 = vpop.f32.mrf.mxu2 }
 0x4b8   :  { %v3452_v38 = vadd.f32 %v2164_v63, %v1361_v0  ;;  %v2134_v0 = vld [vmem:[%s3591_s15 + $0x28] sm:$0xff] }
 0x4ba   :  { %v1386_v34 = vmul.f32 %v1376_v37, %v3452_v38  ;;  %v1475_v17 = vmul.f32 %v1465_v55, %v3452_v38  ;;  %v1653_v2 = vmul.f32 %v1643_v24, %v3452_v38  ;;  %v1564_v61 = vmul.f32 %v1554_v54, %v3452_v38  ;;  %v2137_v24 = vld [vmem:[%s3591_s15 + $0x40] sm:$0xff]  ;;  %v2147_v54 = vld [vmem:[%s3591_s15 + $0x90] sm:$0xff] }
 0x4bb   :  { %v1742_v1 = vmul.f32 %v1732_v3, %v3452_v38  ;;  %1620 = vmatpush.bf16.msrb.mxu1 %v2137_v24  ;;  %v2133_v55 = vld [vmem:[%s3591_s15 + $0x20] sm:$0xff] }
 0x4bc   :  { %v1397_v59 = vpack.c.bf16 %v1386_v34, %v1385_v10  ;;  %v1486_v25 = vpack.c.bf16 %v1475_v17, %v1474_v5  ;;  %v1664_v49 = vpack.c.bf16 %v1653_v2, %v1652_v57  ;;  %v1575_v7 = vpack.c.bf16 %v1564_v61, %v1563_v32  ;;  %v2146_v61 = vld [vmem:[%s3591_s15 + $0x88] sm:$0xff] }
 0x4bd   :  { %v1753_v47 = vpack.c.bf16 %v1742_v1, %v1741_v23 }
 0x4be   :  { %1401 = vrot.lane.b32.xlu1 %v1397_v59, %s2296_s22  ;;  %1490 = vrot.lane.b32.xlu0 %v1486_v25, %s2296_s22 }
 0x4bf   :  { %1668 = vrot.lane.b32.xlu2 %v1664_v49, %s2296_s22  ;;  %v2148_v49 = vld [vmem:[%s3591_s15 + $0x98] sm:$0xff] }
 0x4c6   :  { %1735 = vrot.lane.b32.xlu1 %v420_v35, %s2296_s22 }
 0x4c7   :  { %1579 = vrot.lane.b32.xlu2 %v1575_v7, %s2296_s22 }
 0x4df   :  { %v1364_v50 = vpop.f32.mrf.mxu2 }
 0x4e0   :  { %v3484_v46 = vadd.f32 %v2164_v63, %v1364_v50 }
 0x4e2   :  { %v1387_v42 = vmul.f32 %v1378_v31, %v3484_v46  ;;  %v1654_v39 = vmul.f32 %v1645_v12, %v3484_v46  ;;  %v1565_v9 = vmul.f32 %v1556_v22, %v3484_v46  ;;  %v1476_v31 = vmul.f32 %v1467_v20, %v3484_v46 }
 0x4e3   :  { %v1743_v2 = vmul.f32 %v1734_v62, %v3484_v46 }
 0x4e7   :  { %v1366_v11 = vpop.f32.mrf.mxu2 }
 0x4e8   :  { %v3486_v30 = vadd.f32 %v2164_v63, %v1366_v11  ;;  %v2135_v63 = vld [vmem:[%s3591_s15 + $0x30] sm:$0xff] }
 0x4e9   :  { %1529 = vmatpush.bf16.msrb.mxu0 %v2135_v63 }
 0x4ea   :  { %v1388_v15 = vmul.f32 %v1380_v13, %v3486_v30  ;;  %v1655_v45 = vmul.f32 %v1647_v29, %v3486_v30  ;;  %v1566_v51 = vmul.f32 %v1558_v53, %v3486_v30  ;;  %v1477_v52 = vmul.f32 %v1469_v43, %v3486_v30  ;;  %v2132_v13 = vld [vmem:[%s3591_s15 + $0x18] sm:$0xff]  ;;  %s2297_s15 = smov [#allocation2]  }
 0x4eb   :  { %1439 = vmatpush.bf16.msra.mxu3 %v2132_v13 }
 0x4ec   :  { %v1398_v6 = vpack.c.bf16 %v1388_v15, %v1387_v42  ;;  %v1665_v4 = vpack.c.bf16 %v1655_v45, %v1654_v39  ;;  %v1576_v41 = vpack.c.bf16 %v1566_v51, %v1565_v9  ;;  %v1487_v37 = vpack.c.bf16 %v1477_v52, %v1476_v31 }
 0x4ed   :  { %1530 = vmatpush.bf16.msrb.mxu0 %v2134_v0 }
 0x4ee   :  { %1403 = vrot.lane.b32.xlu1 %v1398_v6, %s2296_s22  ;;  %1670 = vrot.lane.b32.xlu0 %v1665_v4, %s2296_s22 }
 0x4ef   :  { %1440 = vmatpush.bf16.msra.mxu3 %v2131_v60 }
 0x4f1   :  { %1531 = vmatpush.bf16.msrb.mxu0 %v2133_v55 }
 0x4f3   :  { %1441 = vmatpush.bf16.msra.mxu3 %v2130_v27 }
 0x4f6   :  { %1757 = vrot.lane.b32.xlu1 %v1753_v47, %s2296_s22  ;;  %1581 = vrot.lane.b32.xlu0 %v1576_v41, %s2296_s22 }
 0x4f7   :  { %1442 = vmatpush.bf16.msra.mxu3 %v2129_v16 }
 0x4fb   :  { %1795 = vmatpush.bf16.msrb.mxu3 %v2148_v49 }
 0x4fe   :  { %1492 = vrot.lane.b32.xlu1 %v1487_v37, %s2296_s22 }
 0x4ff   :  { %1796 = vmatpush.bf16.msrb.mxu3 %v2147_v54 }
 0x503   :  { %1797 = vmatpush.bf16.msrb.mxu3 %v2146_v61 }
 0x507   :  { %1798 = vmatpush.bf16.msrb.mxu3 %v2145_v40 }
 0x519   :  { %v1669_v10 = vpop.permute.xlu2 %1668 }
 0x51a   :  { %2080 = vmatmul.msk.bf16.vlgmr.msrb.gmra.mxu2 %vm460_vm6, %v1669_v10 }
 0x521   :  { %v1580_v5 = vpop.permute.xlu2 %1579 }
 0x522   :  { %2062 = vmatmul.msk.bf16.vlgmr.msrb.gmra.mxu1 %vm460_vm6, %v1580_v5 }
 0x530   :  { %v1402_v34 = vpop.permute.xlu1 %1401  ;;  %v1491_v17 = vpop.permute.xlu0 %1490 }
 0x531   :  { %2026 = vmatmul.msk.bf16.vlgmr.msra.gmra.mxu3 %vm460_vm6, %v1402_v34  ;;  %2044 = vmatmul.msk.bf16.vlgmr.msrb.gmra.mxu0 %vm460_vm6, %v1491_v17 }
 0x538   :  { %v1736_v57 = vpop.permute.xlu1 %1735 }
 0x539   :  { %v1744_v59 = vmul.f32 %v1736_v57, %v3486_v30 }
 0x53b   :  { %v1754_v25 = vpack.c.bf16 %v1744_v59, %v1743_v2 }
 0x53d   :  { %1759 = vrot.lane.b32.xlu2 %v1754_v25, %s2296_s22  ;;  %s1826_s22 = sshll.u32 %s2297_s15, 4  ;;  %s1827_s22 = int_to_ptr.vmem [resolvable:$true] %s1826_s22 }
 0x560   :  { %v1404_v32 = vpop.permute.xlu1 %1403  ;;  %v1671_v35 = vpop.permute.xlu0 %1670 }
 0x561   :  { %2027 = vmatmul.msk.bf16.gmra.mxu3 %vm460_vm6, %v1404_v32  ;;  %2081 = vmatmul.msk.bf16.gmra.mxu2 %vm460_vm6, %v1671_v35 }
 0x568   :  { %v1758_v7 = vpop.permute.xlu1 %1757  ;;  %v1582_v29 = vpop.permute.xlu0 %1581 }
 0x569   :  { %2063 = vmatmul.msk.bf16.gmra.mxu1 %vm460_vm6, %v1582_v29 }
 0x570   :  { %v1493_v12 = vpop.permute.xlu1 %1492 }
 0x571   :  { %2045 = vmatmul.msk.bf16.gmra.mxu0 %vm460_vm6, %v1493_v12  ;;  %2098 = vmatmul.msk.bf16.vlgmr.msrb.gmra.mxu3 %vm460_vm6, %v1758_v7 }
 0x597   :  { %v1760_v14 = vpop.permute.xlu2 %1759 }
 0x598   :  { %2099 = vmatmul.msk.bf16.gmra.mxu3 %vm460_vm6, %v1760_v14 }
 0x59d   :  { %v1711_v15 = vpop.f32.mrf.mxu2 }
 0x59f   :  { %v1622_v43 = vpop.f32.mrf.mxu1 }
 0x5a7   :  { %v1624_v53 = vpop.f32.mrf.mxu1 }
 0x5ae   :  { %v1533_v58 = vpop.f32.mrf.mxu0 }
 0x5b4   :  { %v1444_v44 = vpop.f32.mrf.mxu3 }
 0x5b5   :  { %v1454_v8 = vadd.f32 %v1444_v44, %v3450_v56  ;;  %v1713_v56 = vpop.f32.mrf.mxu2 }
 0x5b6   :  { %v1535_v39 = vpop.f32.mrf.mxu0 }
 0x5b7   :  { %v1543_v62 = vadd.f32 %v1533_v58, %v1454_v8 }
 0x5b9   :  { %v1632_v42 = vadd.f32 %v1622_v43, %v1543_v62 }
 0x5bb   :  { %v1721_v6 = vadd.f32 %v1711_v15, %v1632_v42 }
 0x5bc   :  { %v1446_v50 = vpop.f32.mrf.mxu3 }
 0x5bd   :  { %v1455_v36 = vadd.f32 %v1446_v50, %v3452_v38 }
 0x5bf   :  { %v1544_v45 = vadd.f32 %v1535_v39, %v1455_v36 }
 0x5c1   :  { %v1633_v51 = vadd.f32 %v1624_v53, %v1544_v45 }
 0x5c3   :  { %v1722_v22 = vadd.f32 %v1713_v56, %v1633_v51 }
 0x5e4   :  { %v1449_v19 = vpop.f32.mrf.mxu3  ;;  %v1716_v18 = vpop.f32.mrf.mxu2 }
 0x5e5   :  { %v1456_v41 = vadd.f32 %v1449_v19, %v3484_v46 }
 0x5e6   :  { %v1627_v20 = vpop.f32.mrf.mxu1 }
 0x5ec   :  { %v1451_v11 = vpop.f32.mrf.mxu3  ;;  %v1718_v0 = vpop.f32.mrf.mxu2 }
 0x5ee   :  { %v1538_v47 = vpop.f32.mrf.mxu0  ;;  %v1629_v63 = vpop.f32.mrf.mxu1 }
 0x5ef   :  { %v1545_v52 = vadd.f32 %v1538_v47, %v1456_v41 }
 0x5f1   :  { %v1634_v31 = vadd.f32 %v1627_v20, %v1545_v52 }
 0x5f3   :  { %v1723_v13 = vadd.f32 %v1716_v18, %v1634_v31 }
 0x5f4   :  { %v1800_v4 = vpop.f32.mrf.mxu3 }
 0x5f5   :  { %v1810_v3 = vadd.f32 %v1800_v4, %v1721_v6 }
 0x5f6   :  { %v1540_v37 = vpop.f32.mrf.mxu0 }
 0x5f7   :  { %v1814_v1 = vsel %vm460_vm6, %v1810_v3, %v3375_v21  ;;  %v1457_v21 = vadd.f32 %v1451_v11, %v3486_v30 }
 0x5f8   :  { %1818 = vst [vmem:[#allocation2] sm:$0xff] %v1814_v1 }
 0x5f9   :  { %v1546_v24 = vadd.f32 %v1540_v37, %v1457_v21 }
 0x5fb   :  { %v1635_v27 = vadd.f32 %v1629_v63, %v1546_v24 }
 0x5fc   :  { %v1802_v23 = vpop.f32.mrf.mxu3 }
 0x5fd   :  { %v1811_v9 = vadd.f32 %v1802_v23, %v1722_v22  ;;  %v1724_v46 = vadd.f32 %v1718_v0, %v1635_v27 }
 0x5ff   :  { %v1815_v38 = vsel %vm460_vm6, %v1811_v9, %v3373_v26 }
 0x600   :  { %1819 = vst [vmem:[#allocation2 + $0x8] sm:$0xff] %v1815_v38 }
 0x61b   :  { %v1805_v48 = vpop.f32.mrf.mxu3 }
 0x61c   :  { %v1812_v60 = vadd.f32 %v1805_v48, %v1723_v13 }
 0x61e   :  { %v1816_v26 = vsel %vm460_vm6, %v1812_v60, %v3390_v33 }
 0x61f   :  { %1820 = vst [vmem:[#allocation2 + $0x10] sm:$0xff] %v1816_v26 }
 0x623   :  { %v1807_v16 = vpop.f32.mrf.mxu3 }
 0x624   :  { %v1813_v30 = vadd.f32 %v1807_v16, %v1724_v46 }
 0x626   :  { %v1817_v55 = vsel %vm460_vm6, %v1813_v30, %v3392_v28 }
 0x627   :  { %1821 = vst [vmem:[#allocation2 + $0x18] sm:$0xff] %v1817_v55 }
 0x628   :  { %1834 = dma.vmem_to_hbm [thread:$0]  %s1827_s22, 512, %s1829_s11, [#allocation3], %s2298_s25, %s2298_s25, %s2299_s12  }
 0x629   :  { %2294 = dma.done.wait [#allocation3], 512  }
 0x62a   :  { %2295 = vsyncadd [#allocation3], 4294966784 }
 0x62b   :  { %1839 = vsyncpa [#allocation3], 1 }

</bundles_post_ra>
